<compile_context>
chip_gen: v7x
topology: tpu7x:2x2x1
jax: 0.10.0
libtpu: 0.0.40
codegen_flags: <defaults>
</compile_context>

<pallas_src>
import numpy as np
import jax
import jax.numpy as jnp
from jax.experimental import pallas as pl
from jax.experimental.pallas import tpu as pltpu

CP = 128   # lane-dense padded channel width (model C=32 padded to 128 lanes)


def _ru(n, m=16):
    return max(m, ((n + m - 1) // m) * m)


# ----------------------------------------------------------------------------
# Pallas kernels (full-array blocks, grid=(1,), one call per hierarchy level)
# ----------------------------------------------------------------------------
def _gcn_bn_relu(x, ea, w, b, root, gat, sca, inv_deg, scale, shift):
    """GCNConv + eval-BatchNorm + ReLU, all intermediates in VMEM/regs.

    x:(Np,CP) f32, ea:(Ep,CP) f32, w:(CP,CP) bf16, gat:(Ep,Np) bf16,
    sca:(Np,Ep) bf16 (symmetric norm folded in), inv_deg:(Np,1) f32.
    """
    bf = jnp.bfloat16
    h = jnp.dot(x.astype(bf), w, preferred_element_type=jnp.float32) + b     # (Np,CP)
    xj = jnp.dot(gat, h.astype(bf), preferred_element_type=jnp.float32)      # (Ep,CP)
    m = jnp.maximum(xj + ea, 0.0)                                            # messages
    agg = jnp.dot(sca, m.astype(bf), preferred_element_type=jnp.float32)     # scatter+norm
    out = agg + jnp.maximum(h + root, 0.0) * inv_deg                         # root term
    return jnp.maximum(out * scale + shift, 0.0)                             # BN + ReLU


def _level0_kernel(x_ref, ea_ref, w_ref, b_ref, root_ref, gat_ref, sca_ref,
                   invdeg_ref, scale_ref, shift_ref, o_ref):
    o_ref[...] = _gcn_bn_relu(x_ref[...], ea_ref[...], w_ref[...], b_ref[...],
                              root_ref[...], gat_ref[...], sca_ref[...],
                              invdeg_ref[...], scale_ref[...], shift_ref[...])


def _up_level_kernel(x_ref, ea_ref, px_ref, pe_ref, wl_ref, bl_ref,
                     w_ref, b_ref, root_ref, gat_ref, sca_ref, invdeg_ref,
                     scale_ref, shift_ref, xo_ref, eao_ref):
    bf = jnp.bfloat16
    # avg node pool + pooled (mean-coalesced) edge attrs, as one-hot matmuls
    xp = jnp.dot(px_ref[...], x_ref[...].astype(bf), preferred_element_type=jnp.float32)
    eap = jnp.dot(pe_ref[...], ea_ref[...].astype(bf), preferred_element_type=jnp.float32)
    # edge Linear encoder
    ea = jnp.dot(eap.astype(bf), wl_ref[...], preferred_element_type=jnp.float32) + bl_ref[...]
    eao_ref[...] = ea
    # GCNConv + BN + ReLU on the coarse graph
    xo_ref[...] = _gcn_bn_relu(xp, ea, w_ref[...], b_ref[...], root_ref[...],
                               gat_ref[...], sca_ref[...], invdeg_ref[...],
                               scale_ref[...], shift_ref[...])


def _down_level_kernel(xc_ref, u_ref, res_ref, ea_ref, w_ref, b_ref, root_ref,
                       gat_ref, sca_ref, invdeg_ref, scale_ref, shift_ref, o_ref):
    bf = jnp.bfloat16
    # 'sum' inter_connect: res + x_coarse[cluster]  (unpool as one-hot matmul)
    x = jnp.dot(u_ref[...], xc_ref[...].astype(bf),
                preferred_element_type=jnp.float32) + res_ref[...]
    o_ref[...] = _gcn_bn_relu(x, ea_ref[...], w_ref[...], b_ref[...], root_ref[...],
                              gat_ref[...], sca_ref[...], invdeg_ref[...],
                              scale_ref[...], shift_ref[...])


def _full_spec(shape):
    nd = len(shape)
    return pl.BlockSpec(shape, lambda *_: (0,) * nd)


def _call(kernel, out_shapes, *args):
    """Single-step pallas_call with full-array blocks. `out_shapes` is a tuple
    (single f32 output) or a list of tuples (multiple f32 outputs)."""
    multi = isinstance(out_shapes, list)
    shapes = out_shapes if multi else [out_shapes]
    out_shape = tuple(jax.ShapeDtypeStruct(s, jnp.float32) for s in shapes)
    out_specs = tuple(_full_spec(s) for s in shapes)
    fn = pl.pallas_call(
        kernel,
        out_shape=out_shape if multi else out_shape[0],
        grid=(1,),
        in_specs=[_full_spec(tuple(a.shape)) for a in args],
        out_specs=out_specs if multi else out_specs[0],
        compiler_params=pltpu.CompilerParams(dimension_semantics=("arbitrary",)),
    )
    return fn(*args)


# ----------------------------------------------------------------------------
# Static graph-structure helpers (setup-time glue, numpy; padded + norm folded)
# ----------------------------------------------------------------------------
def gcn_structs(edge_index, num_nodes):
    row, col = edge_index[0], edge_index[1]
    E = row.shape[0]
    Np, Ep = _ru(num_nodes), _ru(E)
    gat = np.zeros((Ep, Np), np.float32)                    # x_j gather (source)
    gat[np.arange(E), row] = 1.0
    deg = np.bincount(row, minlength=num_nodes).astype(np.float32) + 1.0
    dis = deg ** -0.5
    norm = dis[row] * dis[col]
    sca = np.zeros((Np, Ep), np.float32)                    # scatter-add with norm folded
    sca[col, np.arange(E)] = norm
    inv_deg = np.zeros((Np, 1), np.float32)                 # zero in padded rows
    inv_deg[:num_nodes, 0] = 1.0 / deg
    return gat, sca, inv_deg


def build_pool(cluster, edge_index, num_nodes):
    cluster = np.asarray(cluster)
    nc = int(cluster.max()) + 1
    counts = np.bincount(cluster, minlength=nc).astype(np.float32)
    Np_prev, ncp = _ru(num_nodes), _ru(nc)
    E = edge_index.shape[1]
    Ep_prev = _ru(E)
    # node avg-pool matrix (ncp, Np_prev)
    Px = np.zeros((ncp, Np_prev), np.float32)
    Px[cluster, np.arange(num_nodes)] = 1.0 / counts[cluster]
    # pooled (coalesced) edges, self loops removed, mean-reduced attrs
    r2, c2 = cluster[edge_index[0]], cluster[edge_index[1]]
    mask = r2 != c2
    pairs = np.stack([r2[mask], c2[mask]], axis=1)
    uniq, inv = np.unique(pairs, axis=0, return_inverse=True)
    inv = np.asarray(inv).reshape(-1)
    Ec = uniq.shape[0]
    Ecp = _ru(Ec)
    ecnt = np.bincount(inv, minlength=Ec).astype(np.float32)
    Pe = np.zeros((Ecp, Ep_prev), np.float32)
    Pe[inv, np.nonzero(mask)[0]] = 1.0 / ecnt[inv]
    new_ei = uniq.T.astype(np.int64)
    # unpool (gather by cluster id) matrix (Np_prev, ncp)
    U = np.zeros((Np_prev, ncp), np.float32)
    U[np.arange(num_nodes), cluster] = 1.0
    return Px, Pe, U, new_ei, nc


def ring_graph(num_graphs=2, nodes_per=12):
    edges = []
    for g in range(num_graphs):
        off = g * nodes_per
        for i in range(nodes_per):
            a, b = off + i, off + (i + 1) % nodes_per
            edges.append((a, b))
            edges.append((b, a))
    return np.array(edges, dtype=np.int64).T, num_graphs * nodes_per


# ----------------------------------------------------------------------------
# Parameters (deterministic synthetic init, unpadded model width C)
# ----------------------------------------------------------------------------
def init_params(key, C, depth, atom_vocab=8, atom_feats=9, bond_vocab=4, bond_feats=3):
    keys = iter(jax.random.split(key, 256))

    def nrm(shape, s=0.1):
        return s * jax.random.normal(next(keys), shape, jnp.float32)

    def conv():
        return dict(W=nrm((C, C)), b=nrm((C,)), root=nrm((C,)))

    def bn():
        return dict(gamma=1.0 + nrm((C,)), beta=nrm((C,)),
                    mean=nrm((C,)), var=1.0 + jnp.abs(nrm((C,))))

    return dict(
        atom_emb=[nrm((atom_vocab, C)) for _ in range(atom_feats)],
        bond_emb=[nrm((bond_vocab, C)) for _ in range(bond_feats)],
        up_convs=[conv() for _ in range(depth + 1)],
        up_norms=[bn() for _ in range(depth + 1)],
        up_edge_lin=[dict(W=nrm((C, C)), b=nrm((C,))) for _ in range(depth)],
        down_convs=[conv() for _ in range(depth)],
        down_norms=[bn() for _ in range(depth)],
    )


# ----------------------------------------------------------------------------
# Build: pad / fold / upload constants once, return a jitted forward
# ----------------------------------------------------------------------------
def make_forward(params, edge_index, clusters, N, C, depth):
    # ---- static per-level graph structure (host-side, once) ----
    structs, pools, dims = [], [], []
    ei, n = edge_index, N
    dims.append((n, ei.shape[1]))
    structs.append(gcn_structs(ei, n))
    for cl in clusters:
        Px, Pe, U, ei, n = build_pool(cl, ei, n)
        pools.append((Px, Pe, U))
        dims.append((n, ei.shape[1]))
        structs.append(gcn_structs(ei, n))

    Npad = [_ru(nn) for nn, _ in dims]
    Epad = [_ru(ee) for _, ee in dims]
    N0, E0 = dims[0]

    bf = jnp.bfloat16
    to_bf = lambda a: jnp.asarray(a, bf)
    to_f32 = lambda a: jnp.asarray(a, jnp.float32)

    # device-resident constants, uploaded once (bf16 for MXU operands)
    structs_d = [(to_bf(g), to_bf(s), to_f32(d)) for g, s, d in structs]
    pools_d = [(to_bf(Px), to_bf(Pe), to_bf(U)) for Px, Pe, U in pools]

    def pad_mat(W):                               # (C,C) -> (CP,CP) bf16
        Wp = np.zeros((CP, CP), np.float32)
        Wp[:C, :C] = np.asarray(W)
        return to_bf(Wp)

    def pad_row(v):                               # (C,) -> (1,CP) f32
        vp = np.zeros((1, CP), np.float32)
        vp[0, :C] = np.asarray(v)
        return to_f32(vp)

    def pad_cols(a):                              # (V,C) -> (V,CP) f32
        ap = np.zeros((a.shape[0], CP), np.float32)
        ap[:, :C] = np.asarray(a)
        return to_f32(ap)

    def bn_fold(bp):                              # eval-mode BN -> scale/shift
        g, bta = np.asarray(bp['gamma']), np.asarray(bp['beta'])
        mu, var = np.asarray(bp['mean']), np.asarray(bp['var'])
        scale = g / np.sqrt(var + 1e-5)
        shift = bta - mu * scale
        return pad_row(scale), pad_row(shift)

    atom_emb = [pad_cols(e) for e in params['atom_emb']]
    bond_emb = [pad_cols(e) for e in params['bond_emb']]
    up_conv = [(pad_mat(c['W']), pad_row(c['b']), pad_row(c['root']))
               for c in params['up_convs']]
    up_bn = [bn_fold(b) for b in params['up_norms']]
    up_lin = [(pad_mat(l['W']), pad_row(l['b'])) for l in params['up_edge_lin']]
    down_conv = [(pad_mat(c['W']), pad_row(c['b']), pad_row(c['root']))
                 for c in params['down_convs']]
    down_bn = [bn_fold(b) for b in params['down_norms']]

    @jax.jit
    def fwd(x_int, e_int):
        # Atom / Bond encoders (embedding sums; XLA gathers) + row padding
        x = sum(atom_emb[k][x_int[:, k]] for k in range(x_int.shape[1]))
        ea = sum(bond_emb[k][e_int[:, k]] for k in range(e_int.shape[1]))
        x = jnp.pad(x, ((0, Npad[0] - N0), (0, 0)))
        ea = jnp.pad(ea, ((0, Epad[0] - E0), (0, 0)))

        # ----- up pass, level 0 (conv + BN + ReLU fused; dropout eval = id)
        gat, sca, invd = structs_d[0]
        w, b, root = up_conv[0]
        sc, sh = up_bn[0]
        x = _call(_level0_kernel, (Npad[0], CP),
                  x, ea, w, b, root, gat, sca, invd, sc, sh)
        xs, eas = [x], [ea]

        # ----- up pass, levels 1..depth: pool + edge-lin + conv + BN + ReLU fused
        for lvl in range(1, depth + 1):
            Px, Pe, _ = pools_d[lvl - 1]
            gat, sca, invd = structs_d[lvl]
            wl, bl = up_lin[lvl - 1]
            w, b, root = up_conv[lvl]
            sc, sh = up_bn[lvl]
            x, ea = _call(_up_level_kernel,
                          [(Npad[lvl], CP), (Epad[lvl], CP)],
                          x, ea, Px, Pe, wl, bl, w, b, root,
                          gat, sca, invd, sc, sh)
            if lvl < depth:
                xs.append(x)
                eas.append(ea)

        # ----- down pass ('sum' inter_connect): unpool+res + conv + BN + ReLU fused
        for lvl in reversed(range(depth)):
            res, ea = xs[lvl], eas[lvl]
            U = pools_d[lvl][2]
            gat, sca, invd = structs_d[lvl]
            w, b, root = down_conv[lvl]
            sc, sh = down_bn[lvl]
            x = _call(_down_level_kernel, (Npad[lvl], CP),
                      x, U, res, ea, w, b, root, gat, sca, invd, sc, sh)

        return x[:N0, :C]

    return fwd


# ----------------------------------------------------------------------------
if __name__ == "__main__":
    key = jax.random.PRNGKey(0)
    C, depth = 32, 2

    edge_index, N = ring_graph(num_graphs=2, nodes_per=12)   # N=24, E=48
    k1, k2, k3 = jax.random.split(key, 3)
    x_int = jax.random.randint(k1, (N, 9), 0, 8)                          # atom features
    e_int = jax.random.randint(k2, (edge_index.shape[1], 3), 0, 4)        # bond features
    params = init_params(k3, C, depth)

    # deterministic "Louvain" cluster assignments (see TODO above)
    cluster0 = np.array([(i // 12) * 4 + (i % 12) // 3 for i in range(N)], dtype=np.int64)
    cluster1 = np.array([0, 0, 1, 1, 2, 2, 3, 3], dtype=np.int64)
    clusters = [cluster0, cluster1]

    fwd = make_forward(params, edge_index, clusters, N, C, depth)
    out = jax.block_until_ready(fwd(x_int, e_int))

    assert out.shape == (N, C) and out.dtype == jnp.float32
    assert bool(jnp.all(jnp.isfinite(out)))
    print("KERNEL_OK")
</pallas_src>

<mosaic_0001>
module attributes {stable_mosaic.version = 11 : i64} {
  func.func @_level0_kernel(%arg0: i32, %arg1: memref<32x128xf32, #tpu.memory_space<vmem>>, %arg2: memref<48x128xf32, #tpu.memory_space<vmem>>, %arg3: memref<128x128xbf16, #tpu.memory_space<vmem>>, %arg4: memref<1x128xf32, #tpu.memory_space<vmem>>, %arg5: memref<1x128xf32, #tpu.memory_space<vmem>>, %arg6: memref<48x32xbf16, #tpu.memory_space<vmem>>, %arg7: memref<32x48xbf16, #tpu.memory_space<vmem>>, %arg8: memref<32x1xf32, #tpu.memory_space<vmem>>, %arg9: memref<1x128xf32, #tpu.memory_space<vmem>>, %arg10: memref<1x128xf32, #tpu.memory_space<vmem>>, %arg11: memref<32x128xf32, #tpu.memory_space<vmem>>) attributes {dimension_semantics = [#tpu.dimension_semantics<arbitrary>], iteration_bounds = array<i64: 1>, scalar_prefetch = 0 : i64, scratch_operands = 0 : i64, tpu.core_type = #tpu.core_type<tc>, window_params = [{pipeline_mode = #tpu.pipeline_mode<synchronous>, transform_indices = @transform_0, window_bounds = array<i64: 32, 128>}, {pipeline_mode = #tpu.pipeline_mode<synchronous>, transform_indices = @transform_1, window_bounds = array<i64: 48, 128>}, {pipeline_mode = #tpu.pipeline_mode<synchronous>, transform_indices = @transform_2, window_bounds = array<i64: 128, 128>}, {pipeline_mode = #tpu.pipeline_mode<synchronous>, transform_indices = @transform_3, window_bounds = array<i64: 1, 128>}, {pipeline_mode = #tpu.pipeline_mode<synchronous>, transform_indices = @transform_4, window_bounds = array<i64: 1, 128>}, {pipeline_mode = #tpu.pipeline_mode<synchronous>, transform_indices = @transform_5, window_bounds = array<i64: 48, 32>}, {pipeline_mode = #tpu.pipeline_mode<synchronous>, transform_indices = @transform_6, window_bounds = array<i64: 32, 48>}, {pipeline_mode = #tpu.pipeline_mode<synchronous>, transform_indices = @transform_7, window_bounds = array<i64: 32, 1>}, {pipeline_mode = #tpu.pipeline_mode<synchronous>, transform_indices = @transform_8, window_bounds = array<i64: 1, 128>}, {pipeline_mode = #tpu.pipeline_mode<synchronous>, transform_indices = @transform_9, window_bounds = array<i64: 1, 128>}, {pipeline_mode = #tpu.pipeline_mode<synchronous>, transform_indices = @transform_10, window_bounds = array<i64: 32, 128>}]} {
    %c0 = arith.constant 0 : index
    %c0_0 = arith.constant 0 : index
    %0 = vector.load %arg1[%c0, %c0_0] : memref<32x128xf32, #tpu.memory_space<vmem>>, vector<32x128xf32>
    %c0_1 = arith.constant 0 : index
    %c0_2 = arith.constant 0 : index
    %1 = vector.load %arg2[%c0_1, %c0_2] : memref<48x128xf32, #tpu.memory_space<vmem>>, vector<48x128xf32>
    %c0_3 = arith.constant 0 : index
    %c0_4 = arith.constant 0 : index
    %2 = vector.load %arg3[%c0_3, %c0_4] : memref<128x128xbf16, #tpu.memory_space<vmem>>, vector<128x128xbf16>
    %c0_5 = arith.constant 0 : index
    %c0_6 = arith.constant 0 : index
    %3 = vector.load %arg4[%c0_5, %c0_6] : memref<1x128xf32, #tpu.memory_space<vmem>>, vector<1x128xf32>
    %c0_7 = arith.constant 0 : index
    %c0_8 = arith.constant 0 : index
    %4 = vector.load %arg5[%c0_7, %c0_8] : memref<1x128xf32, #tpu.memory_space<vmem>>, vector<1x128xf32>
    %c0_9 = arith.constant 0 : index
    %c0_10 = arith.constant 0 : index
    %5 = vector.load %arg6[%c0_9, %c0_10] : memref<48x32xbf16, #tpu.memory_space<vmem>>, vector<48x32xbf16>
    %c0_11 = arith.constant 0 : index
    %c0_12 = arith.constant 0 : index
    %6 = vector.load %arg7[%c0_11, %c0_12] : memref<32x48xbf16, #tpu.memory_space<vmem>>, vector<32x48xbf16>
    %c0_13 = arith.constant 0 : index
    %c0_14 = arith.constant 0 : index
    %7 = vector.load %arg8[%c0_13, %c0_14] : memref<32x1xf32, #tpu.memory_space<vmem>>, vector<32x1xf32>
    %c0_15 = arith.constant 0 : index
    %c0_16 = arith.constant 0 : index
    %8 = vector.load %arg9[%c0_15, %c0_16] : memref<1x128xf32, #tpu.memory_space<vmem>>, vector<1x128xf32>
    %c0_17 = arith.constant 0 : index
    %c0_18 = arith.constant 0 : index
    %9 = vector.load %arg10[%c0_17, %c0_18] : memref<1x128xf32, #tpu.memory_space<vmem>>, vector<1x128xf32>
    %10 = arith.truncf %0 : vector<32x128xf32> to vector<32x128xbf16>
    %cst = arith.constant dense<0.000000e+00> : vector<32x128xf32>
    %11 = tpu.matmul %10, %2, %cst {dimension_numbers = #tpu.dot_dimension_numbers<[1], [0], [0], [1], [0, 0, 1, 1], [], []>} : vector<32x128xbf16>, vector<128x128xbf16>, vector<32x128xf32> -> vector<32x128xf32>
    %12 = vector.broadcast %3 : vector<1x128xf32> to vector<32x128xf32>
    %13 = arith.addf %11, %12 : vector<32x128xf32>
    %14 = arith.truncf %13 : vector<32x128xf32> to vector<32x128xbf16>
    %cst_19 = arith.constant dense<0.000000e+00> : vector<48x128xf32>
    %15 = tpu.matmul %5, %14, %cst_19 {dimension_numbers = #tpu.dot_dimension_numbers<[1], [0], [0], [1], [0, 0, 1, 1], [], []>} : vector<48x32xbf16>, vector<32x128xbf16>, vector<48x128xf32> -> vector<48x128xf32>
    %16 = arith.addf %15, %1 : vector<48x128xf32>
    %cst_20 = arith.constant 0.000000e+00 : f32
    %17 = vector.broadcast %cst_20 : f32 to vector<48x128xf32>
    %18 = arith.maximumf %16, %17 : vector<48x128xf32>
    %19 = arith.truncf %18 : vector<48x128xf32> to vector<48x128xbf16>
    %cst_21 = arith.constant dense<0.000000e+00> : vector<32x128xf32>
    %20 = tpu.matmul %6, %19, %cst_21 {dimension_numbers = #tpu.dot_dimension_numbers<[1], [0], [0], [1], [0, 0, 1, 1], [], []>} : vector<32x48xbf16>, vector<48x128xbf16>, vector<32x128xf32> -> vector<32x128xf32>
    %21 = vector.broadcast %4 : vector<1x128xf32> to vector<32x128xf32>
    %22 = arith.addf %13, %21 : vector<32x128xf32>
    %cst_22 = arith.constant 0.000000e+00 : f32
    %23 = vector.broadcast %cst_22 : f32 to vector<32x128xf32>
    %24 = arith.maximumf %22, %23 : vector<32x128xf32>
    %25 = vector.broadcast %7 : vector<32x1xf32> to vector<32x128xf32>
    %26 = arith.mulf %24, %25 : vector<32x128xf32>
    %27 = arith.addf %20, %26 : vector<32x128xf32>
    %28 = vector.broadcast %8 : vector<1x128xf32> to vector<32x128xf32>
    %29 = arith.mulf %27, %28 : vector<32x128xf32>
    %30 = vector.broadcast %9 : vector<1x128xf32> to vector<32x128xf32>
    %31 = arith.addf %29, %30 : vector<32x128xf32>
    %cst_23 = arith.constant 0.000000e+00 : f32
    %32 = vector.broadcast %cst_23 : f32 to vector<32x128xf32>
    %33 = arith.maximumf %31, %32 : vector<32x128xf32>
    %c0_24 = arith.constant 0 : index
    %c0_25 = arith.constant 0 : index
    %34 = vector.load %arg11[%c0_24, %c0_25] : memref<32x128xf32, #tpu.memory_space<vmem>>, vector<32x128xf32>
    tpu.vector_store %arg11[%c0_24, %c0_25], %33 {strides = array<i32>} : memref<32x128xf32, #tpu.memory_space<vmem>>, vector<32x128xf32>,
    return
  }
  func.func @transform_0(%arg0: i32) -> (i32, i32) {
    %c0_i32 = arith.constant 0 : i32
    %c0_i32_0 = arith.constant 0 : i32
    %c0_i32_1 = arith.constant 0 : i32
    return %c0_i32, %c0_i32_0 : i32, i32
  }
  func.func @transform_1(%arg0: i32) -> (i32, i32) {
    %c0_i32 = arith.constant 0 : i32
    %c0_i32_0 = arith.constant 0 : i32
    %c0_i32_1 = arith.constant 0 : i32
    return %c0_i32, %c0_i32_0 : i32, i32
  }
  func.func @transform_2(%arg0: i32) -> (i32, i32) {
    %c0_i32 = arith.constant 0 : i32
    %c0_i32_0 = arith.constant 0 : i32
    %c0_i32_1 = arith.constant 0 : i32
    return %c0_i32, %c0_i32_0 : i32, i32
  }
  func.func @transform_3(%arg0: i32) -> (i32, i32) {
    %c0_i32 = arith.constant 0 : i32
    %c0_i32_0 = arith.constant 0 : i32
    %c0_i32_1 = arith.constant 0 : i32
    return %c0_i32, %c0_i32_0 : i32, i32
  }
  func.func @transform_4(%arg0: i32) -> (i32, i32) {
    %c0_i32 = arith.constant 0 : i32
    %c0_i32_0 = arith.constant 0 : i32
    %c0_i32_1 = arith.constant 0 : i32
    return %c0_i32, %c0_i32_0 : i32, i32
  }
  func.func @transform_5(%arg0: i32) -> (i32, i32) {
    %c0_i32 = arith.constant 0 : i32
    %c0_i32_0 = arith.constant 0 : i32
    %c0_i32_1 = arith.constant 0 : i32
    return %c0_i32, %c0_i32_0 : i32, i32
  }
  func.func @transform_6(%arg0: i32) -> (i32, i32) {
    %c0_i32 = arith.constant 0 : i32
    %c0_i32_0 = arith.constant 0 : i32
    %c0_i32_1 = arith.constant 0 : i32
    return %c0_i32, %c0_i32_0 : i32, i32
  }
  func.func @transform_7(%arg0: i32) -> (i32, i32) {
    %c0_i32 = arith.constant 0 : i32
    %c0_i32_0 = arith.constant 0 : i32
    %c0_i32_1 = arith.constant 0 : i32
    return %c0_i32, %c0_i32_0 : i32, i32
  }
  func.func @transform_8(%arg0: i32) -> (i32, i32) {
    %c0_i32 = arith.constant 0 : i32
    %c0_i32_0 = arith.constant 0 : i32
    %c0_i32_1 = arith.constant 0 : i32
    return %c0_i32, %c0_i32_0 : i32, i32
  }
  func.func @transform_9(%arg0: i32) -> (i32, i32) {
    %c0_i32 = arith.constant 0 : i32
    %c0_i32_0 = arith.constant 0 : i32
    %c0_i32_1 = arith.constant 0 : i32
    return %c0_i32, %c0_i32_0 : i32, i32
  }
  func.func @transform_10(%arg0: i32) -> (i32, i32) {
    %c0_i32 = arith.constant 0 : i32
    %c0_i32_0 = arith.constant 0 : i32
    %c0_i32_1 = arith.constant 0 : i32
    return %c0_i32, %c0_i32_0 : i32, i32
  }
}

module attributes {stable_mosaic.version = 11 : i64} {
  func.func @_up_level_kernel(%arg0: i32, %arg1: memref<16x128xf32, #tpu.memory_space<vmem>>, %arg2: memref<16x128xf32, #tpu.memory_space<vmem>>, %arg3: memref<16x16xbf16, #tpu.memory_space<vmem>>, %arg4: memref<16x16xbf16, #tpu.memory_space<vmem>>, %arg5: memref<128x128xbf16, #tpu.memory_space<vmem>>, %arg6: memref<1x128xf32, #tpu.memory_space<vmem>>, %arg7: memref<128x128xbf16, #tpu.memory_space<vmem>>, %arg8: memref<1x128xf32, #tpu.memory_space<vmem>>, %arg9: memref<1x128xf32, #tpu.memory_space<vmem>>, %arg10: memref<16x16xbf16, #tpu.memory_space<vmem>>, %arg11: memref<16x16xbf16, #tpu.memory_space<vmem>>, %arg12: memref<16x1xf32, #tpu.memory_space<vmem>>, %arg13: memref<1x128xf32, #tpu.memory_space<vmem>>, %arg14: memref<1x128xf32, #tpu.memory_space<vmem>>, %arg15: memref<16x128xf32, #tpu.memory_space<vmem>>, %arg16: memref<16x128xf32, #tpu.memory_space<vmem>>) attributes {dimension_semantics = [#tpu.dimension_semantics<arbitrary>], iteration_bounds = array<i64: 1>, scalar_prefetch = 0 : i64, scratch_operands = 0 : i64, tpu.core_type = #tpu.core_type<tc>, window_params = [{pipeline_mode = #tpu.pipeline_mode<synchronous>, transform_indices = @transform_0, window_bounds = array<i64: 16, 128>}, {pipeline_mode = #tpu.pipeline_mode<synchronous>, transform_indices = @transform_1, window_bounds = array<i64: 16, 128>}, {pipeline_mode = #tpu.pipeline_mode<synchronous>, transform_indices = @transform_2, window_bounds = array<i64: 16, 16>}, {pipeline_mode = #tpu.pipeline_mode<synchronous>, transform_indices = @transform_3, window_bounds = array<i64: 16, 16>}, {pipeline_mode = #tpu.pipeline_mode<synchronous>, transform_indices = @transform_4, window_bounds = array<i64: 128, 128>}, {pipeline_mode = #tpu.pipeline_mode<synchronous>, transform_indices = @transform_5, window_bounds = array<i64: 1, 128>}, {pipeline_mode = #tpu.pipeline_mode<synchronous>, transform_indices = @transform_6, window_bounds = array<i64: 128, 128>}, {pipeline_mode = #tpu.pipeline_mode<synchronous>, transform_indices = @transform_7, window_bounds = array<i64: 1, 128>}, {pipeline_mode = #tpu.pipeline_mode<synchronous>, transform_indices = @transform_8, window_bounds = array<i64: 1, 128>}, {pipeline_mode = #tpu.pipeline_mode<synchronous>, transform_indices = @transform_9, window_bounds = array<i64: 16, 16>}, {pipeline_mode = #tpu.pipeline_mode<synchronous>, transform_indices = @transform_10, window_bounds = array<i64: 16, 16>}, {pipeline_mode = #tpu.pipeline_mode<synchronous>, transform_indices = @transform_11, window_bounds = array<i64: 16, 1>}, {pipeline_mode = #tpu.pipeline_mode<synchronous>, transform_indices = @transform_12, window_bounds = array<i64: 1, 128>}, {pipeline_mode = #tpu.pipeline_mode<synchronous>, transform_indices = @transform_13, window_bounds = array<i64: 1, 128>}, {pipeline_mode = #tpu.pipeline_mode<synchronous>, transform_indices = @transform_14, window_bounds = array<i64: 16, 128>}, {pipeline_mode = #tpu.pipeline_mode<synchronous>, transform_indices = @transform_15, window_bounds = array<i64: 16, 128>}]} {
    %c0 = arith.constant 0 : index
    %c0_0 = arith.constant 0 : index
    %0 = vector.load %arg3[%c0, %c0_0] : memref<16x16xbf16, #tpu.memory_space<vmem>>, vector<16x16xbf16>
    %c0_1 = arith.constant 0 : index
    %c0_2 = arith.constant 0 : index
    %1 = vector.load %arg1[%c0_1, %c0_2] : memref<16x128xf32, #tpu.memory_space<vmem>>, vector<16x128xf32>
    %2 = arith.truncf %1 : vector<16x128xf32> to vector<16x128xbf16>
    %cst = arith.constant dense<0.000000e+00> : vector<16x128xf32>
    %3 = tpu.matmul %0, %2, %cst {dimension_numbers = #tpu.dot_dimension_numbers<[1], [0], [0], [1], [0, 0, 1, 1], [], []>} : vector<16x16xbf16>, vector<16x128xbf16>, vector<16x128xf32> -> vector<16x128xf32>
    %c0_3 = arith.constant 0 : index
    %c0_4 = arith.constant 0 : index
    %4 = vector.load %arg4[%c0_3, %c0_4] : memref<16x16xbf16, #tpu.memory_space<vmem>>, vector<16x16xbf16>
    %c0_5 = arith.constant 0 : index
    %c0_6 = arith.constant 0 : index
    %5 = vector.load %arg2[%c0_5, %c0_6] : memref<16x128xf32, #tpu.memory_space<vmem>>, vector<16x128xf32>
    %6 = arith.truncf %5 : vector<16x128xf32> to vector<16x128xbf16>
    %cst_7 = arith.constant dense<0.000000e+00> : vector<16x128xf32>
    %7 = tpu.matmul %4, %6, %cst_7 {dimension_numbers = #tpu.dot_dimension_numbers<[1], [0], [0], [1], [0, 0, 1, 1], [], []>} : vector<16x16xbf16>, vector<16x128xbf16>, vector<16x128xf32> -> vector<16x128xf32>
    %8 = arith.truncf %7 : vector<16x128xf32> to vector<16x128xbf16>
    %c0_8 = arith.constant 0 : index
    %c0_9 = arith.constant 0 : index
    %9 = vector.load %arg5[%c0_8, %c0_9] : memref<128x128xbf16, #tpu.memory_space<vmem>>, vector<128x128xbf16>
    %cst_10 = arith.constant dense<0.000000e+00> : vector<16x128xf32>
    %10 = tpu.matmul %8, %9, %cst_10 {dimension_numbers = #tpu.dot_dimension_numbers<[1], [0], [0], [1], [0, 0, 1, 1], [], []>} : vector<16x128xbf16>, vector<128x128xbf16>, vector<16x128xf32> -> vector<16x128xf32>
    %c0_11 = arith.constant 0 : index
    %c0_12 = arith.constant 0 : index
    %11 = vector.load %arg6[%c0_11, %c0_12] : memref<1x128xf32, #tpu.memory_space<vmem>>, vector<1x128xf32>
    %12 = vector.broadcast %11 : vector<1x128xf32> to vector<16x128xf32>
    %13 = arith.addf %10, %12 : vector<16x128xf32>
    %c0_13 = arith.constant 0 : index
    %c0_14 = arith.constant 0 : index
    %14 = vector.load %arg16[%c0_13, %c0_14] : memref<16x128xf32, #tpu.memory_space<vmem>>, vector<16x128xf32>
    tpu.vector_store %arg16[%c0_13, %c0_14], %13 {strides = array<i32>} : memref<16x128xf32, #tpu.memory_space<vmem>>, vector<16x128xf32>,
    %c0_15 = arith.constant 0 : index
    %c0_16 = arith.constant 0 : index
    %15 = vector.load %arg7[%c0_15, %c0_16] : memref<128x128xbf16, #tpu.memory_space<vmem>>, vector<128x128xbf16>
    %c0_17 = arith.constant 0 : index
    %c0_18 = arith.constant 0 : index
    %16 = vector.load %arg8[%c0_17, %c0_18] : memref<1x128xf32, #tpu.memory_space<vmem>>, vector<1x128xf32>
    %c0_19 = arith.constant 0 : index
    %c0_20 = arith.constant 0 : index
    %17 = vector.load %arg9[%c0_19, %c0_20] : memref<1x128xf32, #tpu.memory_space<vmem>>, vector<1x128xf32>
    %c0_21 = arith.constant 0 : index
    %c0_22 = arith.constant 0 : index
    %18 = vector.load %arg10[%c0_21, %c0_22] : memref<16x16xbf16, #tpu.memory_space<vmem>>, vector<16x16xbf16>
    %c0_23 = arith.constant 0 : index
    %c0_24 = arith.constant 0 : index
    %19 = vector.load %arg11[%c0_23, %c0_24] : memref<16x16xbf16, #tpu.memory_space<vmem>>, vector<16x16xbf16>
    %c0_25 = arith.constant 0 : index
    %c0_26 = arith.constant 0 : index
    %20 = vector.load %arg12[%c0_25, %c0_26] : memref<16x1xf32, #tpu.memory_space<vmem>>, vector<16x1xf32>
    %c0_27 = arith.constant 0 : index
    %c0_28 = arith.constant 0 : index
    %21 = vector.load %arg13[%c0_27, %c0_28] : memref<1x128xf32, #tpu.memory_space<vmem>>, vector<1x128xf32>
    %c0_29 = arith.constant 0 : index
    %c0_30 = arith.constant 0 : index
    %22 = vector.load %arg14[%c0_29, %c0_30] : memref<1x128xf32, #tpu.memory_space<vmem>>, vector<1x128xf32>
    %23 = arith.truncf %3 : vector<16x128xf32> to vector<16x128xbf16>
    %cst_31 = arith.constant dense<0.000000e+00> : vector<16x128xf32>
    %24 = tpu.matmul %23, %15, %cst_31 {dimension_numbers = #tpu.dot_dimension_numbers<[1], [0], [0], [1], [0, 0, 1, 1], [], []>} : vector<16x128xbf16>, vector<128x128xbf16>, vector<16x128xf32> -> vector<16x128xf32>
    %25 = vector.broadcast %16 : vector<1x128xf32> to vector<16x128xf32>
    %26 = arith.addf %24, %25 : vector<16x128xf32>
    %27 = arith.truncf %26 : vector<16x128xf32> to vector<16x128xbf16>
    %cst_32 = arith.constant dense<0.000000e+00> : vector<16x128xf32>
    %28 = tpu.matmul %18, %27, %cst_32 {dimension_numbers = #tpu.dot_dimension_numbers<[1], [0], [0], [1], [0, 0, 1, 1], [], []>} : vector<16x16xbf16>, vector<16x128xbf16>, vector<16x128xf32> -> vector<16x128xf32>
    %29 = arith.addf %28, %13 : vector<16x128xf32>
    %cst_33 = arith.constant 0.000000e+00 : f32
    %30 = vector.broadcast %cst_33 : f32 to vector<16x128xf32>
    %31 = arith.maximumf %29, %30 : vector<16x128xf32>
    %32 = arith.truncf %31 : vector<16x128xf32> to vector<16x128xbf16>
    %cst_34 = arith.constant dense<0.000000e+00> : vector<16x128xf32>
    %33 = tpu.matmul %19, %32, %cst_34 {dimension_numbers = #tpu.dot_dimension_numbers<[1], [0], [0], [1], [0, 0, 1, 1], [], []>} : vector<16x16xbf16>, vector<16x128xbf16>, vector<16x128xf32> -> vector<16x128xf32>
    %34 = vector.broadcast %17 : vector<1x128xf32> to vector<16x128xf32>
    %35 = arith.addf %26, %34 : vector<16x128xf32>
    %cst_35 = arith.constant 0.000000e+00 : f32
    %36 = vector.broadcast %cst_35 : f32 to vector<16x128xf32>
    %37 = arith.maximumf %35, %36 : vector<16x128xf32>
    %38 = vector.broadcast %20 : vector<16x1xf32> to vector<16x128xf32>
    %39 = arith.mulf %37, %38 : vector<16x128xf32>
    %40 = arith.addf %33, %39 : vector<16x128xf32>
    %41 = vector.broadcast %21 : vector<1x128xf32> to vector<16x128xf32>
    %42 = arith.mulf %40, %41 : vector<16x128xf32>
    %43 = vector.broadcast %22 : vector<1x128xf32> to vector<16x128xf32>
    %44 = arith.addf %42, %43 : vector<16x128xf32>
    %cst_36 = arith.constant 0.000000e+00 : f32
    %45 = vector.broadcast %cst_36 : f32 to vector<16x128xf32>
    %46 = arith.maximumf %44, %45 : vector<16x128xf32>
    %c0_37 = arith.constant 0 : index
    %c0_38 = arith.constant 0 : index
    %47 = vector.load %arg15[%c0_37, %c0_38] : memref<16x128xf32, #tpu.memory_space<vmem>>, vector<16x128xf32>
    tpu.vector_store %arg15[%c0_37, %c0_38], %46 {strides = array<i32>} : memref<16x128xf32, #tpu.memory_space<vmem>>, vector<16x128xf32>,
    return
  }
  func.func @transform_0(%arg0: i32) -> (i32, i32) {
    %c0_i32 = arith.constant 0 : i32
    %c0_i32_0 = arith.constant 0 : i32
    %c0_i32_1 = arith.constant 0 : i32
    return %c0_i32, %c0_i32_0 : i32, i32
  }
  func.func @transform_1(%arg0: i32) -> (i32, i32) {
    %c0_i32 = arith.constant 0 : i32
    %c0_i32_0 = arith.constant 0 : i32
    %c0_i32_1 = arith.constant 0 : i32
    return %c0_i32, %c0_i32_0 : i32, i32
  }
  func.func @transform_2(%arg0: i32) -> (i32, i32) {
    %c0_i32 = arith.constant 0 : i32
    %c0_i32_0 = arith.constant 0 : i32
    %c0_i32_1 = arith.constant 0 : i32
    return %c0_i32, %c0_i32_0 : i32, i32
  }
  func.func @transform_3(%arg0: i32) -> (i32, i32) {
    %c0_i32 = arith.constant 0 : i32
    %c0_i32_0 = arith.constant 0 : i32
    %c0_i32_1 = arith.constant 0 : i32
    return %c0_i32, %c0_i32_0 : i32, i32
  }
  func.func @transform_4(%arg0: i32) -> (i32, i32) {
    %c0_i32 = arith.constant 0 : i32
    %c0_i32_0 = arith.constant 0 : i32
    %c0_i32_1 = arith.constant 0 : i32
    return %c0_i32, %c0_i32_0 : i32, i32
  }
  func.func @transform_5(%arg0: i32) -> (i32, i32) {
    %c0_i32 = arith.constant 0 : i32
    %c0_i32_0 = arith.constant 0 : i32
    %c0_i32_1 = arith.constant 0 : i32
    return %c0_i32, %c0_i32_0 : i32, i32
  }
  func.func @transform_6(%arg0: i32) -> (i32, i32) {
    %c0_i32 = arith.constant 0 : i32
    %c0_i32_0 = arith.constant 0 : i32
    %c0_i32_1 = arith.constant 0 : i32
    return %c0_i32, %c0_i32_0 : i32, i32
  }
  func.func @transform_7(%arg0: i32) -> (i32, i32) {
    %c0_i32 = arith.constant 0 : i32
    %c0_i32_0 = arith.constant 0 : i32
    %c0_i32_1 = arith.constant 0 : i32
    return %c0_i32, %c0_i32_0 : i32, i32
  }
  func.func @transform_8(%arg0: i32) -> (i32, i32) {
    %c0_i32 = arith.constant 0 : i32
    %c0_i32_0 = arith.constant 0 : i32
    %c0_i32_1 = arith.constant 0 : i32
    return %c0_i32, %c0_i32_0 : i32, i32
  }
  func.func @transform_9(%arg0: i32) -> (i32, i32) {
    %c0_i32 = arith.constant 0 : i32
    %c0_i32_0 = arith.constant 0 : i32
    %c0_i32_1 = arith.constant 0 : i32
    return %c0_i32, %c0_i32_0 : i32, i32
  }
  func.func @transform_10(%arg0: i32) -> (i32, i32) {
    %c0_i32 = arith.constant 0 : i32
    %c0_i32_0 = arith.constant 0 : i32
    %c0_i32_1 = arith.constant 0 : i32
    return %c0_i32, %c0_i32_0 : i32, i32
  }
  func.func @transform_11(%arg0: i32) -> (i32, i32) {
    %c0_i32 = arith.constant 0 : i32
    %c0_i32_0 = arith.constant 0 : i32
    %c0_i32_1 = arith.constant 0 : i32
    return %c0_i32, %c0_i32_0 : i32, i32
  }
  func.func @transform_12(%arg0: i32) -> (i32, i32) {
    %c0_i32 = arith.constant 0 : i32
    %c0_i32_0 = arith.constant 0 : i32
    %c0_i32_1 = arith.constant 0 : i32
    return %c0_i32, %c0_i32_0 : i32, i32
  }
  func.func @transform_13(%arg0: i32) -> (i32, i32) {
    %c0_i32 = arith.constant 0 : i32
    %c0_i32_0 = arith.constant 0 : i32
    %c0_i32_1 = arith.constant 0 : i32
    return %c0_i32, %c0_i32_0 : i32, i32
  }
  func.func @transform_14(%arg0: i32) -> (i32, i32) {
    %c0_i32 = arith.constant 0 : i32
    %c0_i32_0 = arith.constant 0 : i32
    %c0_i32_1 = arith.constant 0 : i32
    return %c0_i32, %c0_i32_0 : i32, i32
  }
  func.func @transform_15(%arg0: i32) -> (i32, i32) {
    %c0_i32 = arith.constant 0 : i32
    %c0_i32_0 = arith.constant 0 : i32
    %c0_i32_1 = arith.constant 0 : i32
    return %c0_i32, %c0_i32_0 : i32, i32
  }
}

module attributes {stable_mosaic.version = 11 : i64} {
  func.func @_up_level_kernel(%arg0: i32, %arg1: memref<32x128xf32, #tpu.memory_space<vmem>>, %arg2: memref<48x128xf32, #tpu.memory_space<vmem>>, %arg3: memref<16x32xbf16, #tpu.memory_space<vmem>>, %arg4: memref<16x48xbf16, #tpu.memory_space<vmem>>, %arg5: memref<128x128xbf16, #tpu.memory_space<vmem>>, %arg6: memref<1x128xf32, #tpu.memory_space<vmem>>, %arg7: memref<128x128xbf16, #tpu.memory_space<vmem>>, %arg8: memref<1x128xf32, #tpu.memory_space<vmem>>, %arg9: memref<1x128xf32, #tpu.memory_space<vmem>>, %arg10: memref<16x16xbf16, #tpu.memory_space<vmem>>, %arg11: memref<16x16xbf16, #tpu.memory_space<vmem>>, %arg12: memref<16x1xf32, #tpu.memory_space<vmem>>, %arg13: memref<1x128xf32, #tpu.memory_space<vmem>>, %arg14: memref<1x128xf32, #tpu.memory_space<vmem>>, %arg15: memref<16x128xf32, #tpu.memory_space<vmem>>, %arg16: memref<16x128xf32, #tpu.memory_space<vmem>>) attributes {dimension_semantics = [#tpu.dimension_semantics<arbitrary>], iteration_bounds = array<i64: 1>, scalar_prefetch = 0 : i64, scratch_operands = 0 : i64, tpu.core_type = #tpu.core_type<tc>, window_params = [{pipeline_mode = #tpu.pipeline_mode<synchronous>, transform_indices = @transform_0, window_bounds = array<i64: 32, 128>}, {pipeline_mode = #tpu.pipeline_mode<synchronous>, transform_indices = @transform_1, window_bounds = array<i64: 48, 128>}, {pipeline_mode = #tpu.pipeline_mode<synchronous>, transform_indices = @transform_2, window_bounds = array<i64: 16, 32>}, {pipeline_mode = #tpu.pipeline_mode<synchronous>, transform_indices = @transform_3, window_bounds = array<i64: 16, 48>}, {pipeline_mode = #tpu.pipeline_mode<synchronous>, transform_indices = @transform_4, window_bounds = array<i64: 128, 128>}, {pipeline_mode = #tpu.pipeline_mode<synchronous>, transform_indices = @transform_5, window_bounds = array<i64: 1, 128>}, {pipeline_mode = #tpu.pipeline_mode<synchronous>, transform_indices = @transform_6, window_bounds = array<i64: 128, 128>}, {pipeline_mode = #tpu.pipeline_mode<synchronous>, transform_indices = @transform_7, window_bounds = array<i64: 1, 128>}, {pipeline_mode = #tpu.pipeline_mode<synchronous>, transform_indices = @transform_8, window_bounds = array<i64: 1, 128>}, {pipeline_mode = #tpu.pipeline_mode<synchronous>, transform_indices = @transform_9, window_bounds = array<i64: 16, 16>}, {pipeline_mode = #tpu.pipeline_mode<synchronous>, transform_indices = @transform_10, window_bounds = array<i64: 16, 16>}, {pipeline_mode = #tpu.pipeline_mode<synchronous>, transform_indices = @transform_11, window_bounds = array<i64: 16, 1>}, {pipeline_mode = #tpu.pipeline_mode<synchronous>, transform_indices = @transform_12, window_bounds = array<i64: 1, 128>}, {pipeline_mode = #tpu.pipeline_mode<synchronous>, transform_indices = @transform_13, window_bounds = array<i64: 1, 128>}, {pipeline_mode = #tpu.pipeline_mode<synchronous>, transform_indices = @transform_14, window_bounds = array<i64: 16, 128>}, {pipeline_mode = #tpu.pipeline_mode<synchronous>, transform_indices = @transform_15, window_bounds = array<i64: 16, 128>}]} {
    %c0 = arith.constant 0 : index
    %c0_0 = arith.constant 0 : index
    %0 = vector.load %arg3[%c0, %c0_0] : memref<16x32xbf16, #tpu.memory_space<vmem>>, vector<16x32xbf16>
    %c0_1 = arith.constant 0 : index
    %c0_2 = arith.constant 0 : index
    %1 = vector.load %arg1[%c0_1, %c0_2] : memref<32x128xf32, #tpu.memory_space<vmem>>, vector<32x128xf32>
    %2 = arith.truncf %1 : vector<32x128xf32> to vector<32x128xbf16>
    %cst = arith.constant dense<0.000000e+00> : vector<16x128xf32>
    %3 = tpu.matmul %0, %2, %cst {dimension_numbers = #tpu.dot_dimension_numbers<[1], [0], [0], [1], [0, 0, 1, 1], [], []>} : vector<16x32xbf16>, vector<32x128xbf16>, vector<16x128xf32> -> vector<16x128xf32>
    %c0_3 = arith.constant 0 : index
    %c0_4 = arith.constant 0 : index
    %4 = vector.load %arg4[%c0_3, %c0_4] : memref<16x48xbf16, #tpu.memory_space<vmem>>, vector<16x48xbf16>
    %c0_5 = arith.constant 0 : index
    %c0_6 = arith.constant 0 : index
    %5 = vector.load %arg2[%c0_5, %c0_6] : memref<48x128xf32, #tpu.memory_space<vmem>>, vector<48x128xf32>
    %6 = arith.truncf %5 : vector<48x128xf32> to vector<48x128xbf16>
    %cst_7 = arith.constant dense<0.000000e+00> : vector<16x128xf32>
    %7 = tpu.matmul %4, %6, %cst_7 {dimension_numbers = #tpu.dot_dimension_numbers<[1], [0], [0], [1], [0, 0, 1, 1], [], []>} : vector<16x48xbf16>, vector<48x128xbf16>, vector<16x128xf32> -> vector<16x128xf32>
    %8 = arith.truncf %7 : vector<16x128xf32> to vector<16x128xbf16>
    %c0_8 = arith.constant 0 : index
    %c0_9 = arith.constant 0 : index
    %9 = vector.load %arg5[%c0_8, %c0_9] : memref<128x128xbf16, #tpu.memory_space<vmem>>, vector<128x128xbf16>
    %cst_10 = arith.constant dense<0.000000e+00> : vector<16x128xf32>
    %10 = tpu.matmul %8, %9, %cst_10 {dimension_numbers = #tpu.dot_dimension_numbers<[1], [0], [0], [1], [0, 0, 1, 1], [], []>} : vector<16x128xbf16>, vector<128x128xbf16>, vector<16x128xf32> -> vector<16x128xf32>
    %c0_11 = arith.constant 0 : index
    %c0_12 = arith.constant 0 : index
    %11 = vector.load %arg6[%c0_11, %c0_12] : memref<1x128xf32, #tpu.memory_space<vmem>>, vector<1x128xf32>
    %12 = vector.broadcast %11 : vector<1x128xf32> to vector<16x128xf32>
    %13 = arith.addf %10, %12 : vector<16x128xf32>
    %c0_13 = arith.constant 0 : index
    %c0_14 = arith.constant 0 : index
    %14 = vector.load %arg16[%c0_13, %c0_14] : memref<16x128xf32, #tpu.memory_space<vmem>>, vector<16x128xf32>
    tpu.vector_store %arg16[%c0_13, %c0_14], %13 {strides = array<i32>} : memref<16x128xf32, #tpu.memory_space<vmem>>, vector<16x128xf32>,
    %c0_15 = arith.constant 0 : index
    %c0_16 = arith.constant 0 : index
    %15 = vector.load %arg7[%c0_15, %c0_16] : memref<128x128xbf16, #tpu.memory_space<vmem>>, vector<128x128xbf16>
    %c0_17 = arith.constant 0 : index
    %c0_18 = arith.constant 0 : index
    %16 = vector.load %arg8[%c0_17, %c0_18] : memref<1x128xf32, #tpu.memory_space<vmem>>, vector<1x128xf32>
    %c0_19 = arith.constant 0 : index
    %c0_20 = arith.constant 0 : index
    %17 = vector.load %arg9[%c0_19, %c0_20] : memref<1x128xf32, #tpu.memory_space<vmem>>, vector<1x128xf32>
    %c0_21 = arith.constant 0 : index
    %c0_22 = arith.constant 0 : index
    %18 = vector.load %arg10[%c0_21, %c0_22] : memref<16x16xbf16, #tpu.memory_space<vmem>>, vector<16x16xbf16>
    %c0_23 = arith.constant 0 : index
    %c0_24 = arith.constant 0 : index
    %19 = vector.load %arg11[%c0_23, %c0_24] : memref<16x16xbf16, #tpu.memory_space<vmem>>, vector<16x16xbf16>
    %c0_25 = arith.constant 0 : index
    %c0_26 = arith.constant 0 : index
    %20 = vector.load %arg12[%c0_25, %c0_26] : memref<16x1xf32, #tpu.memory_space<vmem>>, vector<16x1xf32>
    %c0_27 = arith.constant 0 : index
    %c0_28 = arith.constant 0 : index
    %21 = vector.load %arg13[%c0_27, %c0_28] : memref<1x128xf32, #tpu.memory_space<vmem>>, vector<1x128xf32>
    %c0_29 = arith.constant 0 : index
    %c0_30 = arith.constant 0 : index
    %22 = vector.load %arg14[%c0_29, %c0_30] : memref<1x128xf32, #tpu.memory_space<vmem>>, vector<1x128xf32>
    %23 = arith.truncf %3 : vector<16x128xf32> to vector<16x128xbf16>
    %cst_31 = arith.constant dense<0.000000e+00> : vector<16x128xf32>
    %24 = tpu.matmul %23, %15, %cst_31 {dimension_numbers = #tpu.dot_dimension_numbers<[1], [0], [0], [1], [0, 0, 1, 1], [], []>} : vector<16x128xbf16>, vector<128x128xbf16>, vector<16x128xf32> -> vector<16x128xf32>
    %25 = vector.broadcast %16 : vector<1x128xf32> to vector<16x128xf32>
    %26 = arith.addf %24, %25 : vector<16x128xf32>
    %27 = arith.truncf %26 : vector<16x128xf32> to vector<16x128xbf16>
    %cst_32 = arith.constant dense<0.000000e+00> : vector<16x128xf32>
    %28 = tpu.matmul %18, %27, %cst_32 {dimension_numbers = #tpu.dot_dimension_numbers<[1], [0], [0], [1], [0, 0, 1, 1], [], []>} : vector<16x16xbf16>, vector<16x128xbf16>, vector<16x128xf32> -> vector<16x128xf32>
    %29 = arith.addf %28, %13 : vector<16x128xf32>
    %cst_33 = arith.constant 0.000000e+00 : f32
    %30 = vector.broadcast %cst_33 : f32 to vector<16x128xf32>
    %31 = arith.maximumf %29, %30 : vector<16x128xf32>
    %32 = arith.truncf %31 : vector<16x128xf32> to vector<16x128xbf16>
    %cst_34 = arith.constant dense<0.000000e+00> : vector<16x128xf32>
    %33 = tpu.matmul %19, %32, %cst_34 {dimension_numbers = #tpu.dot_dimension_numbers<[1], [0], [0], [1], [0, 0, 1, 1], [], []>} : vector<16x16xbf16>, vector<16x128xbf16>, vector<16x128xf32> -> vector<16x128xf32>
    %34 = vector.broadcast %17 : vector<1x128xf32> to vector<16x128xf32>
    %35 = arith.addf %26, %34 : vector<16x128xf32>
    %cst_35 = arith.constant 0.000000e+00 : f32
    %36 = vector.broadcast %cst_35 : f32 to vector<16x128xf32>
    %37 = arith.maximumf %35, %36 : vector<16x128xf32>
    %38 = vector.broadcast %20 : vector<16x1xf32> to vector<16x128xf32>
    %39 = arith.mulf %37, %38 : vector<16x128xf32>
    %40 = arith.addf %33, %39 : vector<16x128xf32>
    %41 = vector.broadcast %21 : vector<1x128xf32> to vector<16x128xf32>
    %42 = arith.mulf %40, %41 : vector<16x128xf32>
    %43 = vector.broadcast %22 : vector<1x128xf32> to vector<16x128xf32>
    %44 = arith.addf %42, %43 : vector<16x128xf32>
    %cst_36 = arith.constant 0.000000e+00 : f32
    %45 = vector.broadcast %cst_36 : f32 to vector<16x128xf32>
    %46 = arith.maximumf %44, %45 : vector<16x128xf32>
    %c0_37 = arith.constant 0 : index
    %c0_38 = arith.constant 0 : index
    %47 = vector.load %arg15[%c0_37, %c0_38] : memref<16x128xf32, #tpu.memory_space<vmem>>, vector<16x128xf32>
    tpu.vector_store %arg15[%c0_37, %c0_38], %46 {strides = array<i32>} : memref<16x128xf32, #tpu.memory_space<vmem>>, vector<16x128xf32>,
    return
  }
  func.func @transform_0(%arg0: i32) -> (i32, i32) {
    %c0_i32 = arith.constant 0 : i32
    %c0_i32_0 = arith.constant 0 : i32
    %c0_i32_1 = arith.constant 0 : i32
    return %c0_i32, %c0_i32_0 : i32, i32
  }
  func.func @transform_1(%arg0: i32) -> (i32, i32) {
    %c0_i32 = arith.constant 0 : i32
    %c0_i32_0 = arith.constant 0 : i32
    %c0_i32_1 = arith.constant 0 : i32
    return %c0_i32, %c0_i32_0 : i32, i32
  }
  func.func @transform_2(%arg0: i32) -> (i32, i32) {
    %c0_i32 = arith.constant 0 : i32
    %c0_i32_0 = arith.constant 0 : i32
    %c0_i32_1 = arith.constant 0 : i32
    return %c0_i32, %c0_i32_0 : i32, i32
  }
  func.func @transform_3(%arg0: i32) -> (i32, i32) {
    %c0_i32 = arith.constant 0 : i32
    %c0_i32_0 = arith.constant 0 : i32
    %c0_i32_1 = arith.constant 0 : i32
    return %c0_i32, %c0_i32_0 : i32, i32
  }
  func.func @transform_4(%arg0: i32) -> (i32, i32) {
    %c0_i32 = arith.constant 0 : i32
    %c0_i32_0 = arith.constant 0 : i32
    %c0_i32_1 = arith.constant 0 : i32
    return %c0_i32, %c0_i32_0 : i32, i32
  }
  func.func @transform_5(%arg0: i32) -> (i32, i32) {
    %c0_i32 = arith.constant 0 : i32
    %c0_i32_0 = arith.constant 0 : i32
    %c0_i32_1 = arith.constant 0 : i32
    return %c0_i32, %c0_i32_0 : i32, i32
  }
  func.func @transform_6(%arg0: i32) -> (i32, i32) {
    %c0_i32 = arith.constant 0 : i32
    %c0_i32_0 = arith.constant 0 : i32
    %c0_i32_1 = arith.constant 0 : i32
    return %c0_i32, %c0_i32_0 : i32, i32
  }
  func.func @transform_7(%arg0: i32) -> (i32, i32) {
    %c0_i32 = arith.constant 0 : i32
    %c0_i32_0 = arith.constant 0 : i32
    %c0_i32_1 = arith.constant 0 : i32
    return %c0_i32, %c0_i32_0 : i32, i32
  }
  func.func @transform_8(%arg0: i32) -> (i32, i32) {
    %c0_i32 = arith.constant 0 : i32
    %c0_i32_0 = arith.constant 0 : i32
    %c0_i32_1 = arith.constant 0 : i32
    return %c0_i32, %c0_i32_0 : i32, i32
  }
  func.func @transform_9(%arg0: i32) -> (i32, i32) {
    %c0_i32 = arith.constant 0 : i32
    %c0_i32_0 = arith.constant 0 : i32
    %c0_i32_1 = arith.constant 0 : i32
    return %c0_i32, %c0_i32_0 : i32, i32
  }
  func.func @transform_10(%arg0: i32) -> (i32, i32) {
    %c0_i32 = arith.constant 0 : i32
    %c0_i32_0 = arith.constant 0 : i32
    %c0_i32_1 = arith.constant 0 : i32
    return %c0_i32, %c0_i32_0 : i32, i32
  }
  func.func @transform_11(%arg0: i32) -> (i32, i32) {
    %c0_i32 = arith.constant 0 : i32
    %c0_i32_0 = arith.constant 0 : i32
    %c0_i32_1 = arith.constant 0 : i32
    return %c0_i32, %c0_i32_0 : i32, i32
  }
  func.func @transform_12(%arg0: i32) -> (i32, i32) {
    %c0_i32 = arith.constant 0 : i32
    %c0_i32_0 = arith.constant 0 : i32
    %c0_i32_1 = arith.constant 0 : i32
    return %c0_i32, %c0_i32_0 : i32, i32
  }
  func.func @transform_13(%arg0: i32) -> (i32, i32) {
    %c0_i32 = arith.constant 0 : i32
    %c0_i32_0 = arith.constant 0 : i32
    %c0_i32_1 = arith.constant 0 : i32
    return %c0_i32, %c0_i32_0 : i32, i32
  }
  func.func @transform_14(%arg0: i32) -> (i32, i32) {
    %c0_i32 = arith.constant 0 : i32
    %c0_i32_0 = arith.constant 0 : i32
    %c0_i32_1 = arith.constant 0 : i32
    return %c0_i32, %c0_i32_0 : i32, i32
  }
  func.func @transform_15(%arg0: i32) -> (i32, i32) {
    %c0_i32 = arith.constant 0 : i32
    %c0_i32_0 = arith.constant 0 : i32
    %c0_i32_1 = arith.constant 0 : i32
    return %c0_i32, %c0_i32_0 : i32, i32
  }
}

module attributes {stable_mosaic.version = 11 : i64} {
  func.func @_down_level_kernel(%arg0: i32, %arg1: memref<16x128xf32, #tpu.memory_space<vmem>>, %arg2: memref<16x16xbf16, #tpu.memory_space<vmem>>, %arg3: memref<16x128xf32, #tpu.memory_space<vmem>>, %arg4: memref<16x128xf32, #tpu.memory_space<vmem>>, %arg5: memref<128x128xbf16, #tpu.memory_space<vmem>>, %arg6: memref<1x128xf32, #tpu.memory_space<vmem>>, %arg7: memref<1x128xf32, #tpu.memory_space<vmem>>, %arg8: memref<16x16xbf16, #tpu.memory_space<vmem>>, %arg9: memref<16x16xbf16, #tpu.memory_space<vmem>>, %arg10: memref<16x1xf32, #tpu.memory_space<vmem>>, %arg11: memref<1x128xf32, #tpu.memory_space<vmem>>, %arg12: memref<1x128xf32, #tpu.memory_space<vmem>>, %arg13: memref<16x128xf32, #tpu.memory_space<vmem>>) attributes {dimension_semantics = [#tpu.dimension_semantics<arbitrary>], iteration_bounds = array<i64: 1>, scalar_prefetch = 0 : i64, scratch_operands = 0 : i64, tpu.core_type = #tpu.core_type<tc>, window_params = [{pipeline_mode = #tpu.pipeline_mode<synchronous>, transform_indices = @transform_0, window_bounds = array<i64: 16, 128>}, {pipeline_mode = #tpu.pipeline_mode<synchronous>, transform_indices = @transform_1, window_bounds = array<i64: 16, 16>}, {pipeline_mode = #tpu.pipeline_mode<synchronous>, transform_indices = @transform_2, window_bounds = array<i64: 16, 128>}, {pipeline_mode = #tpu.pipeline_mode<synchronous>, transform_indices = @transform_3, window_bounds = array<i64: 16, 128>}, {pipeline_mode = #tpu.pipeline_mode<synchronous>, transform_indices = @transform_4, window_bounds = array<i64: 128, 128>}, {pipeline_mode = #tpu.pipeline_mode<synchronous>, transform_indices = @transform_5, window_bounds = array<i64: 1, 128>}, {pipeline_mode = #tpu.pipeline_mode<synchronous>, transform_indices = @transform_6, window_bounds = array<i64: 1, 128>}, {pipeline_mode = #tpu.pipeline_mode<synchronous>, transform_indices = @transform_7, window_bounds = array<i64: 16, 16>}, {pipeline_mode = #tpu.pipeline_mode<synchronous>, transform_indices = @transform_8, window_bounds = array<i64: 16, 16>}, {pipeline_mode = #tpu.pipeline_mode<synchronous>, transform_indices = @transform_9, window_bounds = array<i64: 16, 1>}, {pipeline_mode = #tpu.pipeline_mode<synchronous>, transform_indices = @transform_10, window_bounds = array<i64: 1, 128>}, {pipeline_mode = #tpu.pipeline_mode<synchronous>, transform_indices = @transform_11, window_bounds = array<i64: 1, 128>}, {pipeline_mode = #tpu.pipeline_mode<synchronous>, transform_indices = @transform_12, window_bounds = array<i64: 16, 128>}]} {
    %c0 = arith.constant 0 : index
    %c0_0 = arith.constant 0 : index
    %0 = vector.load %arg2[%c0, %c0_0] : memref<16x16xbf16, #tpu.memory_space<vmem>>, vector<16x16xbf16>
    %c0_1 = arith.constant 0 : index
    %c0_2 = arith.constant 0 : index
    %1 = vector.load %arg1[%c0_1, %c0_2] : memref<16x128xf32, #tpu.memory_space<vmem>>, vector<16x128xf32>
    %2 = arith.truncf %1 : vector<16x128xf32> to vector<16x128xbf16>
    %cst = arith.constant dense<0.000000e+00> : vector<16x128xf32>
    %3 = tpu.matmul %0, %2, %cst {dimension_numbers = #tpu.dot_dimension_numbers<[1], [0], [0], [1], [0, 0, 1, 1], [], []>} : vector<16x16xbf16>, vector<16x128xbf16>, vector<16x128xf32> -> vector<16x128xf32>
    %c0_3 = arith.constant 0 : index
    %c0_4 = arith.constant 0 : index
    %4 = vector.load %arg3[%c0_3, %c0_4] : memref<16x128xf32, #tpu.memory_space<vmem>>, vector<16x128xf32>
    %5 = arith.addf %3, %4 : vector<16x128xf32>
    %c0_5 = arith.constant 0 : index
    %c0_6 = arith.constant 0 : index
    %6 = vector.load %arg4[%c0_5, %c0_6] : memref<16x128xf32, #tpu.memory_space<vmem>>, vector<16x128xf32>
    %c0_7 = arith.constant 0 : index
    %c0_8 = arith.constant 0 : index
    %7 = vector.load %arg5[%c0_7, %c0_8] : memref<128x128xbf16, #tpu.memory_space<vmem>>, vector<128x128xbf16>
    %c0_9 = arith.constant 0 : index
    %c0_10 = arith.constant 0 : index
    %8 = vector.load %arg6[%c0_9, %c0_10] : memref<1x128xf32, #tpu.memory_space<vmem>>, vector<1x128xf32>
    %c0_11 = arith.constant 0 : index
    %c0_12 = arith.constant 0 : index
    %9 = vector.load %arg7[%c0_11, %c0_12] : memref<1x128xf32, #tpu.memory_space<vmem>>, vector<1x128xf32>
    %c0_13 = arith.constant 0 : index
    %c0_14 = arith.constant 0 : index
    %10 = vector.load %arg8[%c0_13, %c0_14] : memref<16x16xbf16, #tpu.memory_space<vmem>>, vector<16x16xbf16>
    %c0_15 = arith.constant 0 : index
    %c0_16 = arith.constant 0 : index
    %11 = vector.load %arg9[%c0_15, %c0_16] : memref<16x16xbf16, #tpu.memory_space<vmem>>, vector<16x16xbf16>
    %c0_17 = arith.constant 0 : index
    %c0_18 = arith.constant 0 : index
    %12 = vector.load %arg10[%c0_17, %c0_18] : memref<16x1xf32, #tpu.memory_space<vmem>>, vector<16x1xf32>
    %c0_19 = arith.constant 0 : index
    %c0_20 = arith.constant 0 : index
    %13 = vector.load %arg11[%c0_19, %c0_20] : memref<1x128xf32, #tpu.memory_space<vmem>>, vector<1x128xf32>
    %c0_21 = arith.constant 0 : index
    %c0_22 = arith.constant 0 : index
    %14 = vector.load %arg12[%c0_21, %c0_22] : memref<1x128xf32, #tpu.memory_space<vmem>>, vector<1x128xf32>
    %15 = arith.truncf %5 : vector<16x128xf32> to vector<16x128xbf16>
    %cst_23 = arith.constant dense<0.000000e+00> : vector<16x128xf32>
    %16 = tpu.matmul %15, %7, %cst_23 {dimension_numbers = #tpu.dot_dimension_numbers<[1], [0], [0], [1], [0, 0, 1, 1], [], []>} : vector<16x128xbf16>, vector<128x128xbf16>, vector<16x128xf32> -> vector<16x128xf32>
    %17 = vector.broadcast %8 : vector<1x128xf32> to vector<16x128xf32>
    %18 = arith.addf %16, %17 : vector<16x128xf32>
    %19 = arith.truncf %18 : vector<16x128xf32> to vector<16x128xbf16>
    %cst_24 = arith.constant dense<0.000000e+00> : vector<16x128xf32>
    %20 = tpu.matmul %10, %19, %cst_24 {dimension_numbers = #tpu.dot_dimension_numbers<[1], [0], [0], [1], [0, 0, 1, 1], [], []>} : vector<16x16xbf16>, vector<16x128xbf16>, vector<16x128xf32> -> vector<16x128xf32>
    %21 = arith.addf %20, %6 : vector<16x128xf32>
    %cst_25 = arith.constant 0.000000e+00 : f32
    %22 = vector.broadcast %cst_25 : f32 to vector<16x128xf32>
    %23 = arith.maximumf %21, %22 : vector<16x128xf32>
    %24 = arith.truncf %23 : vector<16x128xf32> to vector<16x128xbf16>
    %cst_26 = arith.constant dense<0.000000e+00> : vector<16x128xf32>
    %25 = tpu.matmul %11, %24, %cst_26 {dimension_numbers = #tpu.dot_dimension_numbers<[1], [0], [0], [1], [0, 0, 1, 1], [], []>} : vector<16x16xbf16>, vector<16x128xbf16>, vector<16x128xf32> -> vector<16x128xf32>
    %26 = vector.broadcast %9 : vector<1x128xf32> to vector<16x128xf32>
    %27 = arith.addf %18, %26 : vector<16x128xf32>
    %cst_27 = arith.constant 0.000000e+00 : f32
    %28 = vector.broadcast %cst_27 : f32 to vector<16x128xf32>
    %29 = arith.maximumf %27, %28 : vector<16x128xf32>
    %30 = vector.broadcast %12 : vector<16x1xf32> to vector<16x128xf32>
    %31 = arith.mulf %29, %30 : vector<16x128xf32>
    %32 = arith.addf %25, %31 : vector<16x128xf32>
    %33 = vector.broadcast %13 : vector<1x128xf32> to vector<16x128xf32>
    %34 = arith.mulf %32, %33 : vector<16x128xf32>
    %35 = vector.broadcast %14 : vector<1x128xf32> to vector<16x128xf32>
    %36 = arith.addf %34, %35 : vector<16x128xf32>
    %cst_28 = arith.constant 0.000000e+00 : f32
    %37 = vector.broadcast %cst_28 : f32 to vector<16x128xf32>
    %38 = arith.maximumf %36, %37 : vector<16x128xf32>
    %c0_29 = arith.constant 0 : index
    %c0_30 = arith.constant 0 : index
    %39 = vector.load %arg13[%c0_29, %c0_30] : memref<16x128xf32, #tpu.memory_space<vmem>>, vector<16x128xf32>
    tpu.vector_store %arg13[%c0_29, %c0_30], %38 {strides = array<i32>} : memref<16x128xf32, #tpu.memory_space<vmem>>, vector<16x128xf32>,
    return
  }
  func.func @transform_0(%arg0: i32) -> (i32, i32) {
    %c0_i32 = arith.constant 0 : i32
    %c0_i32_0 = arith.constant 0 : i32
    %c0_i32_1 = arith.constant 0 : i32
    return %c0_i32, %c0_i32_0 : i32, i32
  }
  func.func @transform_1(%arg0: i32) -> (i32, i32) {
    %c0_i32 = arith.constant 0 : i32
    %c0_i32_0 = arith.constant 0 : i32
    %c0_i32_1 = arith.constant 0 : i32
    return %c0_i32, %c0_i32_0 : i32, i32
  }
  func.func @transform_2(%arg0: i32) -> (i32, i32) {
    %c0_i32 = arith.constant 0 : i32
    %c0_i32_0 = arith.constant 0 : i32
    %c0_i32_1 = arith.constant 0 : i32
    return %c0_i32, %c0_i32_0 : i32, i32
  }
  func.func @transform_3(%arg0: i32) -> (i32, i32) {
    %c0_i32 = arith.constant 0 : i32
    %c0_i32_0 = arith.constant 0 : i32
    %c0_i32_1 = arith.constant 0 : i32
    return %c0_i32, %c0_i32_0 : i32, i32
  }
  func.func @transform_4(%arg0: i32) -> (i32, i32) {
    %c0_i32 = arith.constant 0 : i32
    %c0_i32_0 = arith.constant 0 : i32
    %c0_i32_1 = arith.constant 0 : i32
    return %c0_i32, %c0_i32_0 : i32, i32
  }
  func.func @transform_5(%arg0: i32) -> (i32, i32) {
    %c0_i32 = arith.constant 0 : i32
    %c0_i32_0 = arith.constant 0 : i32
    %c0_i32_1 = arith.constant 0 : i32
    return %c0_i32, %c0_i32_0 : i32, i32
  }
  func.func @transform_6(%arg0: i32) -> (i32, i32) {
    %c0_i32 = arith.constant 0 : i32
    %c0_i32_0 = arith.constant 0 : i32
    %c0_i32_1 = arith.constant 0 : i32
    return %c0_i32, %c0_i32_0 : i32, i32
  }
  func.func @transform_7(%arg0: i32) -> (i32, i32) {
    %c0_i32 = arith.constant 0 : i32
    %c0_i32_0 = arith.constant 0 : i32
    %c0_i32_1 = arith.constant 0 : i32
    return %c0_i32, %c0_i32_0 : i32, i32
  }
  func.func @transform_8(%arg0: i32) -> (i32, i32) {
    %c0_i32 = arith.constant 0 : i32
    %c0_i32_0 = arith.constant 0 : i32
    %c0_i32_1 = arith.constant 0 : i32
    return %c0_i32, %c0_i32_0 : i32, i32
  }
  func.func @transform_9(%arg0: i32) -> (i32, i32) {
    %c0_i32 = arith.constant 0 : i32
    %c0_i32_0 = arith.constant 0 : i32
    %c0_i32_1 = arith.constant 0 : i32
    return %c0_i32, %c0_i32_0 : i32, i32
  }
  func.func @transform_10(%arg0: i32) -> (i32, i32) {
    %c0_i32 = arith.constant 0 : i32
    %c0_i32_0 = arith.constant 0 : i32
    %c0_i32_1 = arith.constant 0 : i32
    return %c0_i32, %c0_i32_0 : i32, i32
  }
  func.func @transform_11(%arg0: i32) -> (i32, i32) {
    %c0_i32 = arith.constant 0 : i32
    %c0_i32_0 = arith.constant 0 : i32
    %c0_i32_1 = arith.constant 0 : i32
    return %c0_i32, %c0_i32_0 : i32, i32
  }
  func.func @transform_12(%arg0: i32) -> (i32, i32) {
    %c0_i32 = arith.constant 0 : i32
    %c0_i32_0 = arith.constant 0 : i32
    %c0_i32_1 = arith.constant 0 : i32
    return %c0_i32, %c0_i32_0 : i32, i32
  }
}

module attributes {stable_mosaic.version = 11 : i64} {
  func.func @_down_level_kernel(%arg0: i32, %arg1: memref<16x128xf32, #tpu.memory_space<vmem>>, %arg2: memref<32x16xbf16, #tpu.memory_space<vmem>>, %arg3: memref<32x128xf32, #tpu.memory_space<vmem>>, %arg4: memref<48x128xf32, #tpu.memory_space<vmem>>, %arg5: memref<128x128xbf16, #tpu.memory_space<vmem>>, %arg6: memref<1x128xf32, #tpu.memory_space<vmem>>, %arg7: memref<1x128xf32, #tpu.memory_space<vmem>>, %arg8: memref<48x32xbf16, #tpu.memory_space<vmem>>, %arg9: memref<32x48xbf16, #tpu.memory_space<vmem>>, %arg10: memref<32x1xf32, #tpu.memory_space<vmem>>, %arg11: memref<1x128xf32, #tpu.memory_space<vmem>>, %arg12: memref<1x128xf32, #tpu.memory_space<vmem>>, %arg13: memref<32x128xf32, #tpu.memory_space<vmem>>) attributes {dimension_semantics = [#tpu.dimension_semantics<arbitrary>], iteration_bounds = array<i64: 1>, scalar_prefetch = 0 : i64, scratch_operands = 0 : i64, tpu.core_type = #tpu.core_type<tc>, window_params = [{pipeline_mode = #tpu.pipeline_mode<synchronous>, transform_indices = @transform_0, window_bounds = array<i64: 16, 128>}, {pipeline_mode = #tpu.pipeline_mode<synchronous>, transform_indices = @transform_1, window_bounds = array<i64: 32, 16>}, {pipeline_mode = #tpu.pipeline_mode<synchronous>, transform_indices = @transform_2, window_bounds = array<i64: 32, 128>}, {pipeline_mode = #tpu.pipeline_mode<synchronous>, transform_indices = @transform_3, window_bounds = array<i64: 48, 128>}, {pipeline_mode = #tpu.pipeline_mode<synchronous>, transform_indices = @transform_4, window_bounds = array<i64: 128, 128>}, {pipeline_mode = #tpu.pipeline_mode<synchronous>, transform_indices = @transform_5, window_bounds = array<i64: 1, 128>}, {pipeline_mode = #tpu.pipeline_mode<synchronous>, transform_indices = @transform_6, window_bounds = array<i64: 1, 128>}, {pipeline_mode = #tpu.pipeline_mode<synchronous>, transform_indices = @transform_7, window_bounds = array<i64: 48, 32>}, {pipeline_mode = #tpu.pipeline_mode<synchronous>, transform_indices = @transform_8, window_bounds = array<i64: 32, 48>}, {pipeline_mode = #tpu.pipeline_mode<synchronous>, transform_indices = @transform_9, window_bounds = array<i64: 32, 1>}, {pipeline_mode = #tpu.pipeline_mode<synchronous>, transform_indices = @transform_10, window_bounds = array<i64: 1, 128>}, {pipeline_mode = #tpu.pipeline_mode<synchronous>, transform_indices = @transform_11, window_bounds = array<i64: 1, 128>}, {pipeline_mode = #tpu.pipeline_mode<synchronous>, transform_indices = @transform_12, window_bounds = array<i64: 32, 128>}]} {
    %c0 = arith.constant 0 : index
    %c0_0 = arith.constant 0 : index
    %0 = vector.load %arg2[%c0, %c0_0] : memref<32x16xbf16, #tpu.memory_space<vmem>>, vector<32x16xbf16>
    %c0_1 = arith.constant 0 : index
    %c0_2 = arith.constant 0 : index
    %1 = vector.load %arg1[%c0_1, %c0_2] : memref<16x128xf32, #tpu.memory_space<vmem>>, vector<16x128xf32>
    %2 = arith.truncf %1 : vector<16x128xf32> to vector<16x128xbf16>
    %cst = arith.constant dense<0.000000e+00> : vector<32x128xf32>
    %3 = tpu.matmul %0, %2, %cst {dimension_numbers = #tpu.dot_dimension_numbers<[1], [0], [0], [1], [0, 0, 1, 1], [], []>} : vector<32x16xbf16>, vector<16x128xbf16>, vector<32x128xf32> -> vector<32x128xf32>
    %c0_3 = arith.constant 0 : index
    %c0_4 = arith.constant 0 : index
    %4 = vector.load %arg3[%c0_3, %c0_4] : memref<32x128xf32, #tpu.memory_space<vmem>>, vector<32x128xf32>
    %5 = arith.addf %3, %4 : vector<32x128xf32>
    %c0_5 = arith.constant 0 : index
    %c0_6 = arith.constant 0 : index
    %6 = vector.load %arg4[%c0_5, %c0_6] : memref<48x128xf32, #tpu.memory_space<vmem>>, vector<48x128xf32>
    %c0_7 = arith.constant 0 : index
    %c0_8 = arith.constant 0 : index
    %7 = vector.load %arg5[%c0_7, %c0_8] : memref<128x128xbf16, #tpu.memory_space<vmem>>, vector<128x128xbf16>
    %c0_9 = arith.constant 0 : index
    %c0_10 = arith.constant 0 : index
    %8 = vector.load %arg6[%c0_9, %c0_10] : memref<1x128xf32, #tpu.memory_space<vmem>>, vector<1x128xf32>
    %c0_11 = arith.constant 0 : index
    %c0_12 = arith.constant 0 : index
    %9 = vector.load %arg7[%c0_11, %c0_12] : memref<1x128xf32, #tpu.memory_space<vmem>>, vector<1x128xf32>
    %c0_13 = arith.constant 0 : index
    %c0_14 = arith.constant 0 : index
    %10 = vector.load %arg8[%c0_13, %c0_14] : memref<48x32xbf16, #tpu.memory_space<vmem>>, vector<48x32xbf16>
    %c0_15 = arith.constant 0 : index
    %c0_16 = arith.constant 0 : index
    %11 = vector.load %arg9[%c0_15, %c0_16] : memref<32x48xbf16, #tpu.memory_space<vmem>>, vector<32x48xbf16>
    %c0_17 = arith.constant 0 : index
    %c0_18 = arith.constant 0 : index
    %12 = vector.load %arg10[%c0_17, %c0_18] : memref<32x1xf32, #tpu.memory_space<vmem>>, vector<32x1xf32>
    %c0_19 = arith.constant 0 : index
    %c0_20 = arith.constant 0 : index
    %13 = vector.load %arg11[%c0_19, %c0_20] : memref<1x128xf32, #tpu.memory_space<vmem>>, vector<1x128xf32>
    %c0_21 = arith.constant 0 : index
    %c0_22 = arith.constant 0 : index
    %14 = vector.load %arg12[%c0_21, %c0_22] : memref<1x128xf32, #tpu.memory_space<vmem>>, vector<1x128xf32>
    %15 = arith.truncf %5 : vector<32x128xf32> to vector<32x128xbf16>
    %cst_23 = arith.constant dense<0.000000e+00> : vector<32x128xf32>
    %16 = tpu.matmul %15, %7, %cst_23 {dimension_numbers = #tpu.dot_dimension_numbers<[1], [0], [0], [1], [0, 0, 1, 1], [], []>} : vector<32x128xbf16>, vector<128x128xbf16>, vector<32x128xf32> -> vector<32x128xf32>
    %17 = vector.broadcast %8 : vector<1x128xf32> to vector<32x128xf32>
    %18 = arith.addf %16, %17 : vector<32x128xf32>
    %19 = arith.truncf %18 : vector<32x128xf32> to vector<32x128xbf16>
    %cst_24 = arith.constant dense<0.000000e+00> : vector<48x128xf32>
    %20 = tpu.matmul %10, %19, %cst_24 {dimension_numbers = #tpu.dot_dimension_numbers<[1], [0], [0], [1], [0, 0, 1, 1], [], []>} : vector<48x32xbf16>, vector<32x128xbf16>, vector<48x128xf32> -> vector<48x128xf32>
    %21 = arith.addf %20, %6 : vector<48x128xf32>
    %cst_25 = arith.constant 0.000000e+00 : f32
    %22 = vector.broadcast %cst_25 : f32 to vector<48x128xf32>
    %23 = arith.maximumf %21, %22 : vector<48x128xf32>
    %24 = arith.truncf %23 : vector<48x128xf32> to vector<48x128xbf16>
    %cst_26 = arith.constant dense<0.000000e+00> : vector<32x128xf32>
    %25 = tpu.matmul %11, %24, %cst_26 {dimension_numbers = #tpu.dot_dimension_numbers<[1], [0], [0], [1], [0, 0, 1, 1], [], []>} : vector<32x48xbf16>, vector<48x128xbf16>, vector<32x128xf32> -> vector<32x128xf32>
    %26 = vector.broadcast %9 : vector<1x128xf32> to vector<32x128xf32>
    %27 = arith.addf %18, %26 : vector<32x128xf32>
    %cst_27 = arith.constant 0.000000e+00 : f32
    %28 = vector.broadcast %cst_27 : f32 to vector<32x128xf32>
    %29 = arith.maximumf %27, %28 : vector<32x128xf32>
    %30 = vector.broadcast %12 : vector<32x1xf32> to vector<32x128xf32>
    %31 = arith.mulf %29, %30 : vector<32x128xf32>
    %32 = arith.addf %25, %31 : vector<32x128xf32>
    %33 = vector.broadcast %13 : vector<1x128xf32> to vector<32x128xf32>
    %34 = arith.mulf %32, %33 : vector<32x128xf32>
    %35 = vector.broadcast %14 : vector<1x128xf32> to vector<32x128xf32>
    %36 = arith.addf %34, %35 : vector<32x128xf32>
    %cst_28 = arith.constant 0.000000e+00 : f32
    %37 = vector.broadcast %cst_28 : f32 to vector<32x128xf32>
    %38 = arith.maximumf %36, %37 : vector<32x128xf32>
    %c0_29 = arith.constant 0 : index
    %c0_30 = arith.constant 0 : index
    %39 = vector.load %arg13[%c0_29, %c0_30] : memref<32x128xf32, #tpu.memory_space<vmem>>, vector<32x128xf32>
    tpu.vector_store %arg13[%c0_29, %c0_30], %38 {strides = array<i32>} : memref<32x128xf32, #tpu.memory_space<vmem>>, vector<32x128xf32>,
    return
  }
  func.func @transform_0(%arg0: i32) -> (i32, i32) {
    %c0_i32 = arith.constant 0 : i32
    %c0_i32_0 = arith.constant 0 : i32
    %c0_i32_1 = arith.constant 0 : i32
    return %c0_i32, %c0_i32_0 : i32, i32
  }
  func.func @transform_1(%arg0: i32) -> (i32, i32) {
    %c0_i32 = arith.constant 0 : i32
    %c0_i32_0 = arith.constant 0 : i32
    %c0_i32_1 = arith.constant 0 : i32
    return %c0_i32, %c0_i32_0 : i32, i32
  }
  func.func @transform_2(%arg0: i32) -> (i32, i32) {
    %c0_i32 = arith.constant 0 : i32
    %c0_i32_0 = arith.constant 0 : i32
    %c0_i32_1 = arith.constant 0 : i32
    return %c0_i32, %c0_i32_0 : i32, i32
  }
  func.func @transform_3(%arg0: i32) -> (i32, i32) {
    %c0_i32 = arith.constant 0 : i32
    %c0_i32_0 = arith.constant 0 : i32
    %c0_i32_1 = arith.constant 0 : i32
    return %c0_i32, %c0_i32_0 : i32, i32
  }
  func.func @transform_4(%arg0: i32) -> (i32, i32) {
    %c0_i32 = arith.constant 0 : i32
    %c0_i32_0 = arith.constant 0 : i32
    %c0_i32_1 = arith.constant 0 : i32
    return %c0_i32, %c0_i32_0 : i32, i32
  }
  func.func @transform_5(%arg0: i32) -> (i32, i32) {
    %c0_i32 = arith.constant 0 : i32
    %c0_i32_0 = arith.constant 0 : i32
    %c0_i32_1 = arith.constant 0 : i32
    return %c0_i32, %c0_i32_0 : i32, i32
  }
  func.func @transform_6(%arg0: i32) -> (i32, i32) {
    %c0_i32 = arith.constant 0 : i32
    %c0_i32_0 = arith.constant 0 : i32
    %c0_i32_1 = arith.constant 0 : i32
    return %c0_i32, %c0_i32_0 : i32, i32
  }
  func.func @transform_7(%arg0: i32) -> (i32, i32) {
    %c0_i32 = arith.constant 0 : i32
    %c0_i32_0 = arith.constant 0 : i32
    %c0_i32_1 = arith.constant 0 : i32
    return %c0_i32, %c0_i32_0 : i32, i32
  }
  func.func @transform_8(%arg0: i32) -> (i32, i32) {
    %c0_i32 = arith.constant 0 : i32
    %c0_i32_0 = arith.constant 0 : i32
    %c0_i32_1 = arith.constant 0 : i32
    return %c0_i32, %c0_i32_0 : i32, i32
  }
  func.func @transform_9(%arg0: i32) -> (i32, i32) {
    %c0_i32 = arith.constant 0 : i32
    %c0_i32_0 = arith.constant 0 : i32
    %c0_i32_1 = arith.constant 0 : i32
    return %c0_i32, %c0_i32_0 : i32, i32
  }
  func.func @transform_10(%arg0: i32) -> (i32, i32) {
    %c0_i32 = arith.constant 0 : i32
    %c0_i32_0 = arith.constant 0 : i32
    %c0_i32_1 = arith.constant 0 : i32
    return %c0_i32, %c0_i32_0 : i32, i32
  }
  func.func @transform_11(%arg0: i32) -> (i32, i32) {
    %c0_i32 = arith.constant 0 : i32
    %c0_i32_0 = arith.constant 0 : i32
    %c0_i32_1 = arith.constant 0 : i32
    return %c0_i32, %c0_i32_0 : i32, i32
  }
  func.func @transform_12(%arg0: i32) -> (i32, i32) {
    %c0_i32 = arith.constant 0 : i32
    %c0_i32_0 = arith.constant 0 : i32
    %c0_i32_1 = arith.constant 0 : i32
    return %c0_i32, %c0_i32_0 : i32, i32
  }
}

</mosaic_0001>

<bundles_post_ra>
// kernel: fwd.5
= control target key start
LH: loop header
LB: loop body
LE: loop exit
PB: predicated region body
PF: predicated region fallthrough
CT: control target
= control target key end

     0   :  { %v520_v1 = vmov 0   ;;  %v521_v19 = vmov 0.0   ;;  %vm522_vm0 = vmmov 0   ;;  %vm202_vm1 = vcmask 261120   ;;  %s704_s2 = inlined_call_operand.vmem [shape: bf16[128,128], index: 2, kind: input, shape index: {}]   ;;  %s705_s0 = inlined_call_operand.vmem [shape: f32[32,128], index: 0, kind: input, shape index: {}]   ;;  %s706_s7 = inlined_call_operand.vmem [shape: f32[32,1], index: 7, kind: input, shape index: {}]   ;;  %s707_s5 = inlined_call_operand.vmem [shape: bf16[48,32], index: 5, kind: input, shape index: {}]   ;;  %s708_s3 = inlined_call_operand.vmem [shape: f32[1,128], index: 3, kind: input, shape index: {}]   ;;  %s709_s6 = inlined_call_operand.vmem [shape: bf16[32,48], index: 6, kind: input, shape index: {}]   ;;  %s710_s1 = inlined_call_operand.vmem [shape: f32[48,128], index: 1, kind: input, shape index: {}]   ;;  %s711_s4 = inlined_call_operand.vmem [shape: f32[1,128], index: 4, kind: input, shape index: {}]   ;;  %s712_s8 = inlined_call_operand.vmem [shape: f32[1,128], index: 8, kind: input, shape index: {}]   ;;  %s713_s9 = inlined_call_operand.vmem [shape: f32[1,128], index: 9, kind: input, shape index: {}]   ;;  %s714_s10 = inlined_call_operand.vmem [shape: f32[32,128], index: 10, kind: output, shape index: {}]  }
   0x1   :  { %v507_v0 = vld [vmem:[%s704_s2] sm:$0xff]   ;;  %506 = vset.pattern.permute.xlu1 %v520_v1  ;;  %505 = vset.pattern.permute.xlu0 %v520_v1  ;;  %v508_v2 = vld [vmem:[%s704_s2 + $0x8] sm:$0xff]   ;;  %v509_v3 = vld [vmem:[%s704_s2 + $0x10] sm:$0xff]   ;;  %vm326_vm2 = vcmask 392192  }
   0x2   :  { %456 = vmatprep.subr.bf16.mxu0 %v507_v0  ;;  %v510_v4 = vld [vmem:[%s704_s2 + $0x18] sm:$0xff]   ;;  %v36_v5 = vld [vmem:[%s705_s0] sm:$0xff]  ;;  %v37_v6 = vld [vmem:[%s705_s0 + $0x8] sm:$0xff]  ;;  %476 = vmatprep.subr.bf16.mxu1 %v521_v19 }
   0x3   :  { %457 = vmatpush3.bf16.msra.mxu0 %v507_v0  ;;  %v80_v7 = vpack.c.bf16 %v37_v6, %v36_v5  ;;  %v76_v8 = vld [vmem:[%s706_s7 + $0x10] sm:$0xff]  ;;  %v74_v9 = vld [vmem:[%s706_s7] sm:$0xff]  ;;  %v77_v10 = vld [vmem:[%s706_s7 + $0x18] sm:$0xff]  ;;  %480 = vmatprep.mubr.msk.bf16.mxu1 %vm522_vm0, %v521_v19 }
   0x4   :  { %458 = vmatprep.subr.bf16.mxu0 %v508_v2  ;;  %304 = vperm.xlu1 %506, %v76_v8   ;;  %v75_v11 = vld [vmem:[%s706_s7 + $0x8] sm:$0xff]  ;;  %v511_v12 = vld [vmem:[%s704_s2 + $0x20] sm:$0xff]   ;;  %v513_v14 = vld [vmem:[%s704_s2 + $0x30] sm:$0xff]  }
   0x5   :  { %294 = vperm.xlu0 %505, %v74_v9   ;;  %472 = vmatprep.mubr.bf16.mxu0 %v80_v7  ;;  %v512_v13 = vld [vmem:[%s704_s2 + $0x28] sm:$0xff]   ;;  %v514_v15 = vld [vmem:[%s704_s2 + $0x38] sm:$0xff]   ;;  %v38_v16 = vld [vmem:[%s705_s0 + $0x10] sm:$0xff] }
   0x6   :  { %v39_v17 = vld [vmem:[%s705_s0 + $0x18] sm:$0xff]  ;;  %v414_v21 = vld [vmem:[%s708_s3] ss:$0 sm:$0xff]  ;;  %v516_v32 = vld [vmem:[%s707_s5 + $0x8] sm:$0xff]  }
   0x7   :  { %459 = vmatpush3.bf16.msra.mxu0 %v508_v2  ;;  %v81_v18 = vpack.c.bf16 %v39_v17, %v38_v16  ;;  %v515_v31 = vld [vmem:[%s707_s5] sm:$0xff]   ;;  %v517_v33 = vld [vmem:[%s707_s5 + $0x10] sm:$0xff]   ;;  %v41_v37 = vld [vmem:[%s710_s1 + $0x8] sm:$0xff] }
   0x8   :  { %460 = vmatprep.subr.bf16.mxu0 %v509_v3  ;;  %309 = vperm.xlu1 %506, %v77_v10   ;;  %v518_v34 = vld [vmem:[%s709_s6] sm:$0xff]   ;;  %v42_v45 = vld [vmem:[%s710_s1 + $0x10] sm:$0xff]  ;;  %v43_v48 = vld [vmem:[%s710_s1 + $0x18] sm:$0xff] }
   0x9   :  { %299 = vperm.xlu0 %505, %v75_v11   ;;  %v40_v35 = vld [vmem:[%s710_s1] sm:$0xff]  ;;  %v45_v59 = vld [vmem:[%s710_s1 + $0x28] sm:$0xff] }
   0xa   :  { %v44_v56 = vld [vmem:[%s710_s1 + $0x20] sm:$0xff] }
   0xb   :  { %461 = vmatpush3.bf16.msra.mxu0 %v509_v3  ;;  %v429_v5 = vld [vmem:[%s711_s4] ss:$0 sm:$0xff] }
   0xc   :  { %462 = vmatprep.subr.bf16.mxu0 %v510_v4 }
   0xf   :  { %463 = vmatpush3.bf16.msra.mxu0 %v510_v4  ;;  %v519_v4 = vld [vmem:[%s709_s6 + $0x8] sm:$0xff]  }
  0x10   :  { %464 = vmatprep.subr.bf16.mxu0 %v511_v12 }
  0x13   :  { %465 = vmatpush3.bf16.msra.mxu0 %v511_v12 }
  0x14   :  { %466 = vmatprep.subr.bf16.mxu0 %v512_v13 }
  0x17   :  { %467 = vmatpush3.bf16.msra.mxu0 %v512_v13 }
  0x18   :  { %468 = vmatprep.subr.bf16.mxu0 %v513_v14 }
  0x1b   :  { %469 = vmatpush3.bf16.msra.mxu0 %v513_v14 }
  0x1c   :  { %470 = vmatprep.subr.bf16.mxu0 %v514_v15 }
  0x1f   :  { %471 = vmatpush3.bf16.msra.mxu0 %v514_v15 }
  0x22   :  { %473 = vmatmul.mubr.bf16.vlgmr.msra.gmra.mrb[0].mxu0 %v81_v18 }
  0x83   :  { %v305_v8 = vpop.permute.xlu1 %304 }
  0x84   :  { %v295_v10 = vpop.permute.xlu0 %294 }
  0x87   :  { %v310_v15 = vpop.permute.xlu1 %309 }
  0x88   :  { %v300_v18 = vpop.permute.xlu0 %299 }
  0xf5   :  { %v474_v20 = vpop.f32.mrb[0].mxu0 }
  0xf6   :  { %v170_v22 = vpop.f32.mrb[1].mxu0  ;;  %v630_v24 = vadd.f32 %v474_v20, %v414_v21  ;;  %v434_v20 = vld [vmem:[%s712_s8] ss:$0 sm:$0xff] }
  0xf7   :  { %v475_v23 = vpop.f32.mrb[2].mxu0  ;;  %v634_v27 = vadd.f32 %v414_v21, %v170_v22 }
  0xf8   :  { %v632_v25 = vadd.f32 %v475_v23, %v414_v21  ;;  %v173_v26 = vpop.f32.mrb[3].mxu0  ;;  %v286_v6 = vadd.f32 %v429_v5, %v630_v24 }
  0xf9   :  { %v636_v28 = vadd.f32 %v414_v21, %v173_v26  ;;  %v284_v7 = vadd.f32 %v429_v5, %v634_v27  ;;  %v435_v26 = vld [vmem:[%s713_s9] ss:$0 sm:$0xff] }
  0xfa   :  { %v186_v29 = vpack.c.bf16 %v632_v25, %v630_v24  ;;  %v287_v9 = vadd.f32 %v429_v5, %v632_v25  ;;  %v290_v12 = vmax.f32 %v286_v6, 0.0 }
  0xfb   :  { %v185_v30 = vpack.c.bf16 %v636_v28, %v634_v27  ;;  %v285_v11 = vadd.f32 %v429_v5, %v636_v28  ;;  %v288_v13 = vmax.f32 %v284_v7, 0.0 }
  0xfc   :  { %v291_v14 = vmax.f32 %v287_v9, 0.0  ;;  %v314_v17 = vmul.f32 %v305_v8, %v290_v12 }
  0xfd   :  { %477 = vmatpush3.bf16.msra.mxu1 %v185_v30  ;;  %v289_v16 = vmax.f32 %v285_v11, 0.0 }
  0xfe   :  { %478 = vmatprep.subr.bf16.mxu1 %v521_v19  ;;  %v315_v22 = vmul.f32 %v310_v15, %v291_v14 }
  0xff   :  { %v313_v25 = vmul.f32 %v300_v18, %v289_v16 }
 0x101   :  { %479 = vmatpush3.bf16.msra.mxu1 %v186_v29 }
 0x104   :  { %481 = vmatmul.mubr.msk.bf16.vlgmr.msra.gmra.mrb[0].mxu1 %vm202_vm1, %v515_v31 }
 0x105   :  { %484 = vmatprep.mubr.msk.bf16.mxu1 %vm522_vm0, %v521_v19 }
 0x10c   :  { %485 = vmatmul.mubr.msk.bf16.gmra.mrb[4].mxu1 %vm202_vm1, %v516_v32 }
 0x10d   :  { %488 = vmatprep.mubr.msk.bf16.mxu1 %vm522_vm0, %v521_v19  ;;  %v312_v19 = vmul.f32 %v295_v10, %v288_v13 }
 0x114   :  { %489 = vmatmul.mubr.msk.bf16.gmra.mrb[8].mxu1 %vm202_vm1, %v517_v33 }
 0x115   :  { %498 = vmatprep.mubr.msk.bf16.mxu1 %vm326_vm2, %v518_v34 }
 0x1d7   :  { %v246_v36 = vpop.f32.mrb[0].mxu1 }
 0x1d8   :  { %v247_v38 = vadd.f32 %v246_v36, %v40_v35  ;;  %v482_v39 = vpop.f32.mrb[1].mxu1 }
 0x1d9   :  { %v249_v40 = vpop.f32.mrb[2].mxu1 }
 0x1da   :  { %v250_v41 = vadd.f32 %v249_v40, %v41_v37  ;;  %v483_v42 = vpop.f32.mrb[3].mxu1  ;;  %v269_v43 = vmax.f32 %v247_v38, 0.0 }
 0x1dc   :  { %v270_v44 = vmax.f32 %v250_v41, 0.0 }
 0x1de   :  { %v275_v46 = vpack.c.bf16 %v270_v44, %v269_v43 }
 0x1df   :  { %v254_v47 = vpop.f32.mrb[4].mxu1 }
 0x1e0   :  { %v255_v49 = vadd.f32 %v254_v47, %v42_v45  ;;  %v486_v50 = vpop.f32.mrb[5].mxu1  ;;  %492 = vmatprep.subr.bf16.mxu1 %v275_v46 }
 0x1e1   :  { %v257_v51 = vpop.f32.mrb[6].mxu1  ;;  %493 = vmatpush3.bf16.msra.mxu1 %v275_v46 }
 0x1e2   :  { %v258_v52 = vadd.f32 %v257_v51, %v43_v48  ;;  %v487_v53 = vpop.f32.mrb[7].mxu1  ;;  %v271_v54 = vmax.f32 %v255_v49, 0.0 }
 0x1e4   :  { %v272_v55 = vmax.f32 %v258_v52, 0.0 }
 0x1e6   :  { %v276_v57 = vpack.c.bf16 %v272_v55, %v271_v54 }
 0x1e7   :  { %v262_v58 = vpop.f32.mrb[8].mxu1 }
 0x1e8   :  { %v263_v60 = vadd.f32 %v262_v58, %v44_v56  ;;  %v490_v61 = vpop.f32.mrb[9].mxu1  ;;  %494 = vmatprep.subr.bf16.mxu1 %v276_v57 }
 0x1e9   :  { %v265_v62 = vpop.f32.mrb[10].mxu1  ;;  %495 = vmatpush3.bf16.msra.mxu1 %v276_v57 }
 0x1ea   :  { %v266_v63 = vadd.f32 %v265_v62, %v45_v59  ;;  %v491_v0 = vpop.f32.mrb[11].mxu1  ;;  %v273_v1 = vmax.f32 %v263_v60, 0.0 }
 0x1ec   :  { %v274_v2 = vmax.f32 %v266_v63, 0.0 }
 0x1ee   :  { %v277_v3 = vpack.c.bf16 %v274_v2, %v273_v1 }
 0x1f0   :  { %496 = vmatprep.subr.bf16.mxu1 %v277_v3 }
 0x1f1   :  { %497 = vmatpush3.bf16.msra.mxu1 %v277_v3 }
 0x1f4   :  { %499 = vmatmul.mubr.msk.bf16.vlgmr.msra.gmra.mrb[12].mxu1 %vm326_vm2, %v519_v4 }
 0x2c7   :  { %v500_v21 = vpop.f32.mrb[12].mxu1 }
 0x2c8   :  { %v376_v23 = vadd.f32 %v500_v21, %v314_v17  ;;  %v367_v24 = vpop.f32.mrb[13].mxu1 }
 0x2c9   :  { %v368_v27 = vadd.f32 %v367_v24, %v312_v19  ;;  %v501_v28 = vpop.f32.mrb[14].mxu1 }
 0x2ca   :  { %v390_v29 = vmul.f32 %v434_v20, %v376_v23  ;;  %v379_v30 = vadd.f32 %v501_v28, %v315_v22  ;;  %v370_v31 = vpop.f32.mrb[15].mxu1 }
 0x2cb   :  { %v388_v32 = vmul.f32 %v434_v20, %v368_v27  ;;  %v371_v33 = vadd.f32 %v370_v31, %v313_v25 }
 0x2cc   :  { %v400_v34 = vadd.f32 %v435_v26, %v390_v29  ;;  %v391_v35 = vmul.f32 %v434_v20, %v379_v30 }
 0x2cd   :  { %v398_v36 = vadd.f32 %v435_v26, %v388_v32  ;;  %v389_v37 = vmul.f32 %v434_v20, %v371_v33 }
 0x2ce   :  { %v404_v38 = vmax.f32 %v400_v34, 0.0  ;;  %v401_v39 = vadd.f32 %v435_v26, %v391_v35 }
 0x2cf   :  { %v402_v40 = vmax.f32 %v398_v36, 0.0  ;;  %v399_v41 = vadd.f32 %v435_v26, %v389_v37 }
 0x2d0   :  { %408 = vst [vmem:[%s714_s10 + $0x10] sm:$0xff] %v404_v38  ;;  %v405_v42 = vmax.f32 %v401_v39, 0.0 }
 0x2d1   :  { %406 = vst [vmem:[%s714_s10] sm:$0xff] %v402_v40  ;;  %v403_v43 = vmax.f32 %v399_v41, 0.0 }
 0x2d2   :  { %409 = vst [vmem:[%s714_s10 + $0x18] sm:$0xff] %v405_v42 }
 0x2d3   :  { %407 = vst [vmem:[%s714_s10 + $0x8] sm:$0xff] %v403_v43 }

// kernel: fwd.7
= control target key start
LH: loop header
LB: loop body
LE: loop exit
PB: predicated region body
PF: predicated region fallthrough
CT: control target
= control target key end

     0   :  { %v731_v2 = vmov 0.0   ;;  %vm732_vm0 = vmmov 0   ;;  %vm61_vm1 = vcmask 130048   ;;  %s964_s0 = inlined_call_operand.vmem [shape: f32[16,128], index: 0, kind: input, shape index: {}]   ;;  %s965_s1 = inlined_call_operand.vmem [shape: f32[16,128], index: 1, kind: input, shape index: {}]   ;;  %s966_s2 = inlined_call_operand.vmem [shape: bf16[16,16], index: 2, kind: input, shape index: {}]   ;;  %s967_s3 = inlined_call_operand.vmem [shape: bf16[16,16], index: 3, kind: input, shape index: {}]   ;;  %s968_s4 = inlined_call_operand.vmem [shape: bf16[128,128], index: 4, kind: input, shape index: {}]   ;;  %s969_s5 = inlined_call_operand.vmem [shape: f32[1,128], index: 5, kind: input, shape index: {}]   ;;  %s970_s6 = inlined_call_operand.vmem [shape: bf16[128,128], index: 6, kind: input, shape index: {}]   ;;  %s971_s7 = inlined_call_operand.vmem [shape: f32[1,128], index: 7, kind: input, shape index: {}]   ;;  %s972_s8 = inlined_call_operand.vmem [shape: f32[1,128], index: 8, kind: input, shape index: {}]   ;;  %s973_s9 = inlined_call_operand.vmem [shape: bf16[16,16], index: 9, kind: input, shape index: {}]   ;;  %s974_s10 = inlined_call_operand.vmem [shape: bf16[16,16], index: 10, kind: input, shape index: {}]   ;;  %s975_s11 = inlined_call_operand.vmem [shape: f32[16,1], index: 11, kind: input, shape index: {}]   ;;  %s976_s12 = inlined_call_operand.vmem [shape: f32[1,128], index: 12, kind: input, shape index: {}]   ;;  %s977_s13 = inlined_call_operand.vmem [shape: f32[1,128], index: 13, kind: input, shape index: {}]   ;;  %s978_s14 = inlined_call_operand.vmem [shape: f32[16,128], index: 14, kind: output, shape index: {0}]   ;;  %s979_s15 = inlined_call_operand.hbm [shape: f32[16,128], index: 15, kind: output, shape index: {1}]  }
   0x1   :  { %v53_v0 = vld [vmem:[%s964_s0] sm:$0xff]  ;;  %v54_v1 = vld [vmem:[%s964_s0 + $0x8] sm:$0xff]  ;;  %616 = vmatprep.subr.bf16.mxu0 %v731_v2  ;;  %618 = vmatprep.mubr.msk.bf16.mxu0 %vm732_vm0, %v731_v2  ;;  %v691_v11 = vld [vmem:[%s970_s6 + $0x10] sm:$0xff]  }
   0x2   :  { %v55_v3 = vpack.c.bf16 %v54_v1, %v53_v0  ;;  %v687_v4 = vld [vmem:[%s966_s2] sm:$0xff]   ;;  %622 = vmatprep.subr.bf16.mxu1 %v731_v2  ;;  %v109_v6 = vld [vmem:[%s965_s1 + $0x8] sm:$0xff]  ;;  %624 = vmatprep.mubr.msk.bf16.mxu1 %vm732_vm0, %v731_v2  ;;  %v692_v12 = vld [vmem:[%s970_s6 + $0x18] sm:$0xff]  }
   0x3   :  { %v108_v5 = vld [vmem:[%s965_s1] sm:$0xff]  ;;  %v690_v10 = vld [vmem:[%s970_s6 + $0x8] sm:$0xff]  }
   0x4   :  { %617 = vmatpush3.bf16.msra.mxu0 %v55_v3  ;;  %v110_v7 = vpack.c.bf16 %v109_v6, %v108_v5  ;;  %v688_v8 = vld [vmem:[%s967_s3] sm:$0xff]  }
   0x5   :  { %628 = vmatprep.subr.bf16.mxu0 %v731_v2  ;;  %v689_v9 = vld [vmem:[%s970_s6] sm:$0xff]  }
   0x6   :  { %623 = vmatpush3.bf16.msra.mxu1 %v110_v7 }
   0x7   :  { %619 = vmatmul.mubr.msk.bf16.vlgmr.msra.gmra.mrb[0].mxu0 %vm61_vm1, %v687_v4  ;;  %648 = vmatprep.subr.bf16.mxu1 %v731_v2 }
   0x8   :  { %644 = vmatprep.mubr.msk.bf16.mxu0 %vm732_vm0, %v731_v2 }
   0x9   :  { %625 = vmatmul.mubr.msk.bf16.vlgmr.msra.gmra.mrb[0].mxu1 %vm61_vm1, %v688_v8 }
   0xa   :  { %649 = vmatpush3.bf16.msra.mxu1 %v689_v9  ;;  %664 = vmatprep.mubr.msk.bf16.mxu1 %vm732_vm0, %v731_v2 }
   0xb   :  { %650 = vmatprep.subr.bf16.mxu1 %v731_v2 }
   0xe   :  { %651 = vmatpush3.bf16.msra.mxu1 %v690_v10 }
   0xf   :  { %652 = vmatprep.subr.bf16.mxu1 %v731_v2 }
  0x12   :  { %653 = vmatpush3.bf16.msra.mxu1 %v691_v11 }
  0x13   :  { %21 = vsyncpa [#allocation3], 0  ;;  %654 = vmatprep.subr.bf16.mxu1 %v731_v2  ;;  %v693_v13 = vld [vmem:[%s970_s6 + $0x20] sm:$0xff]   ;;  %v694_v14 = vld [vmem:[%s970_s6 + $0x28] sm:$0xff]   ;;  %v733_v19 = vmov 0  }
  0x14   :  { %v695_v15 = vld [vmem:[%s970_s6 + $0x30] sm:$0xff]   ;;  %v696_v16 = vld [vmem:[%s970_s6 + $0x38] sm:$0xff]   ;;  %v297_v17 = vld [vmem:[%s975_s11] sm:$0xff]  ;;  %686 = vset.pattern.permute.xlu0 %v733_v19 }
  0x15   :  { %v697_v18 = vld [vmem:[%s968_s4] sm:$0xff]   ;;  %462 = vperm.xlu0 %686, %v297_v17   ;;  %v698_v20 = vld [vmem:[%s968_s4 + $0x8] sm:$0xff]   ;;  %v699_v22 = vld [vmem:[%s968_s4 + $0x10] sm:$0xff]  }
  0x16   :  { %655 = vmatpush3.bf16.msra.mxu1 %v692_v12  ;;  %629 = vmatpush3.bf16.msra.mxu0 %v697_v18  ;;  %v298_v21 = vld [vmem:[%s975_s11 + $0x8] sm:$0xff]  ;;  %v700_v23 = vld [vmem:[%s968_s4 + $0x18] sm:$0xff]   ;;  %v701_v24 = vld [vmem:[%s968_s4 + $0x20] sm:$0xff]  }
  0x17   :  { %656 = vmatprep.subr.bf16.mxu1 %v731_v2  ;;  %630 = vmatprep.subr.bf16.mxu0 %v731_v2  ;;  %v702_v25 = vld [vmem:[%s968_s4 + $0x28] sm:$0xff]   ;;  %v703_v26 = vld [vmem:[%s968_s4 + $0x30] sm:$0xff]   ;;  %v704_v27 = vld [vmem:[%s968_s4 + $0x38] sm:$0xff]  }
  0x18   :  { %v574_v38 = vld [vmem:[%s971_s7] ss:$0 sm:$0xff] }
  0x19   :  { %467 = vperm.xlu0 %686, %v298_v21   ;;  %v565_v40 = vld [vmem:[%s969_s5] ss:$0 sm:$0xff] }
  0x1a   :  { %657 = vmatpush3.bf16.msra.mxu1 %v693_v13  ;;  %631 = vmatpush3.bf16.msra.mxu0 %v698_v20  ;;  %v705_v53 = vld [vmem:[%s973_s9] sm:$0xff]   ;;  %s734_s9 = smov [#allocation2]  }
  0x1b   :  { %658 = vmatprep.subr.bf16.mxu1 %v731_v2  ;;  %632 = vmatprep.subr.bf16.mxu0 %v731_v2  ;;  %v706_v63 = vld [vmem:[%s974_s10] sm:$0xff]   ;;  %s548_s29 = sshll.u32 %s734_s9, 4  ;;  %s549_s29 = int_to_ptr.vmem [resolvable:$true] %s548_s29 }
  0x1c   :  { %s707_s1 = scalar_lea.vmem %s549_s29, 256  ;;  %p712_p1 = scmp.lt.s32.totalorder %s549_s29, %s549_s29 }
  0x1d   :  { %p708_p0 = scmp.ne.s32.totalorder %s549_s29, %s707_s1  ;;  %p713_p2 = scmp.lt.s32.totalorder %s707_s1, %s707_s1 }
  0x1e   :  { %659 = vmatpush3.bf16.msra.mxu1 %v694_v14  ;;  %633 = vmatpush3.bf16.msra.mxu0 %v699_v22 }
  0x1f   :  { %660 = vmatprep.subr.bf16.mxu1 %v731_v2  ;;  %634 = vmatprep.subr.bf16.mxu0 %v731_v2  ;;  %p714_p3 = por %p713_p2, %p712_p1 }
  0x21   :  { %p715_p4 = pnand %p714_p3, %p708_p0 }
  0x22   :  { %661 = vmatpush3.bf16.msra.mxu1 %v695_v15  ;;  %635 = vmatpush3.bf16.msra.mxu0 %v700_v23 }
  0x23   :  { %662 = vmatprep.subr.bf16.mxu1 %v731_v2  ;;  %636 = vmatprep.subr.bf16.mxu0 %v731_v2 }
  0x26   :  { %663 = vmatpush3.bf16.msra.mxu1 %v696_v16  ;;  %637 = vmatpush3.bf16.msra.mxu0 %v701_v24 }
  0x27   :  { %674 = vmatprep.subr.bf16.mxu1 %v731_v2  ;;  %638 = vmatprep.subr.bf16.mxu0 %v731_v2 }
  0x2a   :  { %639 = vmatpush3.bf16.msra.mxu0 %v702_v25 }
  0x2b   :  { %640 = vmatprep.subr.bf16.mxu0 %v731_v2 }
  0x2e   :  { %641 = vmatpush3.bf16.msra.mxu0 %v703_v26 }
  0x2f   :  { %642 = vmatprep.subr.bf16.mxu0 %v731_v2 }
  0x32   :  { %643 = vmatpush3.bf16.msra.mxu0 %v704_v27 }
  0x33   :  { %668 = vmatprep.subr.bf16.mxu0 %v731_v2 }
  0xda   :  { %v99_v28 = vpop.f32.mrb[0].mxu0 }
  0xdb   :  { %v620_v29 = vpop.f32.mrb[1].mxu0 }
  0xdc   :  { %v102_v30 = vpop.f32.mrb[2].mxu0  ;;  %v153_v31 = vpop.f32.mrb[0].mxu1 }
  0xdd   :  { %v301_v32 = vpack.c.bf16 %v102_v30, %v99_v28  ;;  %v621_v33 = vpop.f32.mrb[3].mxu0  ;;  %v626_v34 = vpop.f32.mrb[1].mxu1 }
  0xde   :  { %v156_v35 = vpop.f32.mrb[2].mxu1 }
  0xdf   :  { %665 = vmatmul.mubr.bf16.vlgmr.msra.gmra.mrb[4].mxu1 %v301_v32  ;;  %v160_v36 = vpack.c.bf16 %v156_v35, %v153_v31  ;;  %v627_v37 = vpop.f32.mrb[3].mxu1 }
  0xe0   :  { %676 = vmatprep.mubr.msk.bf16.mxu1 %vm732_vm0, %v731_v2 }
  0xe1   :  { %645 = vmatmul.mubr.bf16.vlgmr.msra.gmra.mrb[4].mxu0 %v160_v36 }
  0xe2   :  { %670 = vmatprep.mubr.msk.bf16.mxu0 %vm732_vm0, %v731_v2 }
 0x1b2   :  { %v390_v39 = vpop.f32.mrb[4].mxu1 }
 0x1b3   :  { %v666_v41 = vpop.f32.mrb[5].mxu1  ;;  %v391_v44 = vadd.f32 %v574_v38, %v390_v39 }
 0x1b4   :  { %v393_v42 = vpop.f32.mrb[6].mxu1  ;;  %v266_v43 = vpop.f32.mrb[4].mxu0 }
 0x1b5   :  { %v394_v45 = vadd.f32 %v574_v38, %v393_v42  ;;  %v667_v46 = vpop.f32.mrb[7].mxu1  ;;  %v267_v47 = vadd.f32 %v565_v40, %v266_v43  ;;  %v646_v48 = vpop.f32.mrb[5].mxu0 }
 0x1b6   :  { %v269_v49 = vpop.f32.mrb[6].mxu0 }
 0x1b7   :  { %v397_v50 = vpack.c.bf16 %v394_v45, %v391_v44  ;;  %273 = vst [vmem:[#allocation2] sm:$0xff] %v267_v47  ;;  %v270_v51 = vadd.f32 %v565_v40, %v269_v49  ;;  %v647_v52 = vpop.f32.mrb[7].mxu0 }
 0x1b9   :  { %669 = vmatpush3.bf16.msra.mxu0 %v397_v50  ;;  %274 = vst [vmem:[#allocation2 + $0x8] sm:$0xff] %v270_v51 }
 0x1bc   :  { %671 = vmatmul.mubr.msk.bf16.vlgmr.msra.gmra.mrb[8].mxu0 %vm61_vm1, %v705_v53 }
 0x28f   :  { %v440_v54 = vpop.f32.mrb[8].mxu0 }
 0x290   :  { %v441_v55 = vadd.f32 %v440_v54, %v267_v47  ;;  %v672_v56 = vpop.f32.mrb[9].mxu0 }
 0x291   :  { %v443_v57 = vpop.f32.mrb[10].mxu0 }
 0x292   :  { %v444_v58 = vadd.f32 %v443_v57, %v270_v51  ;;  %v673_v59 = vpop.f32.mrb[11].mxu0  ;;  %v447_v60 = vmax.f32 %v441_v55, 0.0 }
 0x294   :  { %v448_v61 = vmax.f32 %v444_v58, 0.0 }
 0x296   :  { %v449_v62 = vpack.c.bf16 %v448_v61, %v447_v60 }
 0x298   :  { %675 = vmatpush3.bf16.msra.mxu1 %v449_v62 }
 0x29b   :  { %677 = vmatmul.mubr.msk.bf16.vlgmr.msra.gmra.mrb[8].mxu1 %vm61_vm1, %v706_v63 }
 0x29c   :  { %718 = shalt.err (!%p715_p4)
}
 0x29d   :  { %s719_s3 = scalar_lea.hbm %s979_s15, 256 }
 0x29e   :  { %p720_p5 = scmp.ne.s32.totalorder %s979_s15, %s719_s3  ;;  %p723_p6 = scmp.lt.u32.totalorder %s719_s3, %s979_s15 }
 0x2a0   :  { %p725_p7 = pnand %p723_p6, %p720_p5 }
 0x2a2   :  { %728 = shalt.err (!%p725_p7)
}
 0x2a3   :  { %s735_s19 = smov 128   ;;  %s736_s11 = smov 8   ;;  %v585_v0 = vld [vmem:[%s972_s8] ss:$0 sm:$0xff]  ;;  %v463_v2 = vpop.permute.xlu0 %462 }
 0x2a4   :  { %554 = dma.vmem_to_hbm [thread:$0]  %s549_s29, 256, %s979_s15, [#allocation3], %s735_s19, %s735_s19, %s736_s11   ;;  %v456_v1 = vadd.f32 %v585_v0, %v391_v44  ;;  %v457_v3 = vadd.f32 %v585_v0, %v394_v45 }
 0x2a5   :  { %v588_v8 = vld [vmem:[%s976_s12] ss:$0 sm:$0xff] }
 0x2a6   :  { %v458_v4 = vmax.f32 %v456_v1, 0.0  ;;  %v459_v5 = vmax.f32 %v457_v3, 0.0  ;;  %v589_v13 = vld [vmem:[%s977_s13] ss:$0 sm:$0xff] }
 0x2a7   :  { %v468_v6 = vpop.permute.xlu0 %467 }
 0x2a8   :  { %v470_v7 = vmul.f32 %v463_v2, %v458_v4  ;;  %v471_v10 = vmul.f32 %v468_v6, %v459_v5 }
 0x36e   :  { %v514_v9 = vpop.f32.mrb[8].mxu1 }
 0x36f   :  { %v515_v11 = vadd.f32 %v514_v9, %v470_v7  ;;  %v678_v12 = vpop.f32.mrb[9].mxu1 }
 0x370   :  { %v517_v14 = vpop.f32.mrb[10].mxu1 }
 0x371   :  { %v527_v15 = vmul.f32 %v588_v8, %v515_v11  ;;  %v518_v16 = vadd.f32 %v517_v14, %v471_v10  ;;  %v679_v17 = vpop.f32.mrb[11].mxu1 }
 0x373   :  { %v535_v18 = vadd.f32 %v589_v13, %v527_v15  ;;  %v528_v19 = vmul.f32 %v588_v8, %v518_v16 }
 0x375   :  { %v537_v20 = vmax.f32 %v535_v18, 0.0  ;;  %v536_v21 = vadd.f32 %v589_v13, %v528_v19 }
 0x377   :  { %539 = vst [vmem:[%s978_s14] sm:$0xff] %v537_v20  ;;  %v538_v22 = vmax.f32 %v536_v21, 0.0 }
 0x379   :  { %540 = vst [vmem:[%s978_s14 + $0x8] sm:$0xff] %v538_v22 }
 0x37a   :  { %729 = dma.done.wait [#allocation3], 256  }
 0x37b   :  { %730 = vsyncadd [#allocation3], 4294967040 }
 0x37c   :  { %560 = vsyncpa [#allocation3], 1 }

// kernel: fwd.8
= control target key start
LH: loop header
LB: loop body
LE: loop exit
PB: predicated region body
PF: predicated region fallthrough
CT: control target
= control target key end

     0   :  { %v457_v0 = vmov 0.0   ;;  %vm458_vm0 = vmmov 0   ;;  %vm54_vm1 = vcmask 130048   ;;  %v459_v13 = vmov 0   ;;  %s622_s0 = inlined_call_operand.vmem [shape: f32[16,128], index: 0, kind: input, shape index: {}]   ;;  %s623_s1 = inlined_call_operand.vmem [shape: bf16[16,16], index: 1, kind: input, shape index: {}]   ;;  %s624_s4 = inlined_call_operand.vmem [shape: bf16[128,128], index: 4, kind: input, shape index: {}]   ;;  %s625_s9 = inlined_call_operand.vmem [shape: f32[16,1], index: 9, kind: input, shape index: {}]   ;;  %s626_s2 = inlined_call_operand.vmem [shape: f32[16,128], index: 2, kind: input, shape index: {}]   ;;  %s627_s7 = inlined_call_operand.vmem [shape: bf16[16,16], index: 7, kind: input, shape index: {}]   ;;  %s628_s5 = inlined_call_operand.vmem [shape: f32[1,128], index: 5, kind: input, shape index: {}]   ;;  %s629_s8 = inlined_call_operand.vmem [shape: bf16[16,16], index: 8, kind: input, shape index: {}]   ;;  %s630_s3 = inlined_call_operand.vmem [shape: f32[16,128], index: 3, kind: input, shape index: {}]   ;;  %s631_s6 = inlined_call_operand.vmem [shape: f32[1,128], index: 6, kind: input, shape index: {}]   ;;  %s632_s10 = inlined_call_operand.vmem [shape: f32[1,128], index: 10, kind: input, shape index: {}]   ;;  %s633_s11 = inlined_call_operand.vmem [shape: f32[1,128], index: 11, kind: input, shape index: {}]   ;;  %s634_s12 = inlined_call_operand.vmem [shape: f32[16,128], index: 12, kind: output, shape index: {}]  }
   0x1   :  { %404 = vmatprep.subr.bf16.mxu0 %v457_v0  ;;  %v44_v1 = vld [vmem:[%s622_s0] sm:$0xff]  ;;  %v45_v2 = vld [vmem:[%s622_s0 + $0x8] sm:$0xff]  ;;  %406 = vmatprep.mubr.msk.bf16.mxu0 %vm458_vm0, %v457_v0  ;;  %v449_v7 = vld [vmem:[%s624_s4 + $0x10] sm:$0xff]  }
   0x2   :  { %v46_v3 = vpack.c.bf16 %v45_v2, %v44_v1  ;;  %v446_v4 = vld [vmem:[%s623_s1] sm:$0xff]   ;;  %410 = vmatprep.subr.bf16.mxu1 %v457_v0  ;;  %426 = vmatprep.mubr.msk.bf16.mxu1 %vm458_vm0, %v457_v0  ;;  %v448_v6 = vld [vmem:[%s624_s4 + $0x8] sm:$0xff]   ;;  %v450_v8 = vld [vmem:[%s624_s4 + $0x18] sm:$0xff]  }
   0x3   :  { %v447_v5 = vld [vmem:[%s624_s4] sm:$0xff]   ;;  %v452_v10 = vld [vmem:[%s624_s4 + $0x28] sm:$0xff]   ;;  %v453_v11 = vld [vmem:[%s624_s4 + $0x30] sm:$0xff]   ;;  %445 = vset.pattern.permute.xlu0 %v459_v13 }
   0x4   :  { %405 = vmatpush3.bf16.msra.mxu0 %v46_v3  ;;  %411 = vmatpush3.bf16.msra.mxu1 %v447_v5  ;;  %v451_v9 = vld [vmem:[%s624_s4 + $0x20] sm:$0xff]   ;;  %v454_v12 = vld [vmem:[%s624_s4 + $0x38] sm:$0xff]   ;;  %v124_v15 = vld [vmem:[%s625_s9 + $0x8] sm:$0xff] }
   0x5   :  { %430 = vmatprep.subr.bf16.mxu0 %v457_v0  ;;  %412 = vmatprep.subr.bf16.mxu1 %v457_v0  ;;  %v123_v14 = vld [vmem:[%s625_s9] sm:$0xff]  ;;  %v48_v18 = vld [vmem:[%s626_s2 + $0x8] sm:$0xff] }
   0x6   :  { %288 = vperm.xlu0 %445, %v123_v14   ;;  %v47_v16 = vld [vmem:[%s626_s2] sm:$0xff]  ;;  %v100_v36 = vld [vmem:[%s630_s3 + $0x8] sm:$0xff] }
   0x7   :  { %407 = vmatmul.mubr.msk.bf16.vlgmr.msra.gmra.mrb[0].mxu0 %vm54_vm1, %v446_v4  ;;  %v373_v25 = vld [vmem:[%s628_s5] ss:$0 sm:$0xff] }
   0x8   :  { %432 = vmatprep.mubr.msk.bf16.mxu0 %vm458_vm0, %v457_v0  ;;  %413 = vmatpush3.bf16.msra.mxu1 %v448_v6  ;;  %v455_v33 = vld [vmem:[%s627_s7] sm:$0xff]  }
   0x9   :  { %414 = vmatprep.subr.bf16.mxu1 %v457_v0  ;;  %v99_v34 = vld [vmem:[%s630_s3] sm:$0xff] }
   0xa   :  { %293 = vperm.xlu0 %445, %v124_v15   ;;  %v456_v45 = vld [vmem:[%s629_s8] sm:$0xff]  }
   0xb   :  { %v384_v46 = vld [vmem:[%s631_s6] ss:$0 sm:$0xff] }
   0xc   :  { %415 = vmatpush3.bf16.msra.mxu1 %v449_v7  ;;  %v387_v54 = vld [vmem:[%s632_s10] ss:$0 sm:$0xff] }
   0xd   :  { %416 = vmatprep.subr.bf16.mxu1 %v457_v0  ;;  %v388_v59 = vld [vmem:[%s633_s11] ss:$0 sm:$0xff] }
  0x10   :  { %417 = vmatpush3.bf16.msra.mxu1 %v450_v8 }
  0x11   :  { %418 = vmatprep.subr.bf16.mxu1 %v457_v0 }
  0x14   :  { %419 = vmatpush3.bf16.msra.mxu1 %v451_v9 }
  0x15   :  { %420 = vmatprep.subr.bf16.mxu1 %v457_v0 }
  0x18   :  { %421 = vmatpush3.bf16.msra.mxu1 %v452_v10 }
  0x19   :  { %422 = vmatprep.subr.bf16.mxu1 %v457_v0 }
  0x1c   :  { %423 = vmatpush3.bf16.msra.mxu1 %v453_v11 }
  0x1d   :  { %424 = vmatprep.subr.bf16.mxu1 %v457_v0 }
  0x20   :  { %425 = vmatpush3.bf16.msra.mxu1 %v454_v12 }
  0x85   :  { %v289_v48 = vpop.permute.xlu0 %288 }
  0x89   :  { %v294_v52 = vpop.permute.xlu0 %293 }
  0xda   :  { %v92_v17 = vpop.f32.mrb[0].mxu0 }
  0xdb   :  { %v408_v19 = vpop.f32.mrb[1].mxu0  ;;  %v93_v21 = vadd.f32 %v92_v17, %v47_v16 }
  0xdc   :  { %v95_v20 = vpop.f32.mrb[2].mxu0 }
  0xdd   :  { %v96_v22 = vadd.f32 %v95_v20, %v48_v18  ;;  %v409_v23 = vpop.f32.mrb[3].mxu0 }
  0xdf   :  { %v127_v24 = vpack.c.bf16 %v96_v22, %v93_v21 }
  0xe1   :  { %427 = vmatmul.mubr.bf16.vlgmr.msra.gmra.mrb[0].mxu1 %v127_v24 }
 0x1b4   :  { %v216_v26 = vpop.f32.mrb[0].mxu1 }
 0x1b5   :  { %v428_v27 = vpop.f32.mrb[1].mxu1  ;;  %v217_v29 = vadd.f32 %v373_v25, %v216_v26 }
 0x1b6   :  { %v219_v28 = vpop.f32.mrb[2].mxu1 }
 0x1b7   :  { %v220_v30 = vadd.f32 %v373_v25, %v219_v28  ;;  %v429_v31 = vpop.f32.mrb[3].mxu1  ;;  %v282_v47 = vadd.f32 %v384_v46, %v217_v29 }
 0x1b9   :  { %v223_v32 = vpack.c.bf16 %v220_v30, %v217_v29  ;;  %v283_v49 = vadd.f32 %v384_v46, %v220_v30  ;;  %v284_v50 = vmax.f32 %v282_v47, 0.0 }
 0x1bb   :  { %431 = vmatpush3.bf16.msra.mxu0 %v223_v32  ;;  %v285_v51 = vmax.f32 %v283_v49, 0.0  ;;  %v296_v53 = vmul.f32 %v289_v48, %v284_v50 }
 0x1bc   :  { %436 = vmatprep.subr.bf16.mxu0 %v457_v0 }
 0x1bd   :  { %v297_v56 = vmul.f32 %v294_v52, %v285_v51 }
 0x1be   :  { %433 = vmatmul.mubr.msk.bf16.vlgmr.msra.gmra.mrb[4].mxu0 %vm54_vm1, %v455_v33 }
 0x1bf   :  { %438 = vmatprep.mubr.msk.bf16.mxu0 %vm458_vm0, %v457_v0 }
 0x291   :  { %v266_v35 = vpop.f32.mrb[4].mxu0 }
 0x292   :  { %v267_v37 = vadd.f32 %v266_v35, %v99_v34  ;;  %v434_v38 = vpop.f32.mrb[5].mxu0 }
 0x293   :  { %v269_v39 = vpop.f32.mrb[6].mxu0 }
 0x294   :  { %v270_v40 = vadd.f32 %v269_v39, %v100_v36  ;;  %v435_v41 = vpop.f32.mrb[7].mxu0  ;;  %v273_v42 = vmax.f32 %v267_v37, 0.0 }
 0x296   :  { %v274_v43 = vmax.f32 %v270_v40, 0.0 }
 0x298   :  { %v275_v44 = vpack.c.bf16 %v274_v43, %v273_v42 }
 0x29a   :  { %437 = vmatpush3.bf16.msra.mxu0 %v275_v44 }
 0x29d   :  { %439 = vmatmul.mubr.msk.bf16.vlgmr.msra.gmra.mrb[8].mxu0 %vm54_vm1, %v456_v45 }
 0x370   :  { %v340_v55 = vpop.f32.mrb[8].mxu0 }
 0x371   :  { %v341_v57 = vadd.f32 %v340_v55, %v296_v53  ;;  %v440_v58 = vpop.f32.mrb[9].mxu0 }
 0x372   :  { %v343_v60 = vpop.f32.mrb[10].mxu0 }
 0x373   :  { %v353_v61 = vmul.f32 %v387_v54, %v341_v57  ;;  %v344_v62 = vadd.f32 %v343_v60, %v297_v56  ;;  %v441_v63 = vpop.f32.mrb[11].mxu0 }
 0x375   :  { %v361_v0 = vadd.f32 %v388_v59, %v353_v61  ;;  %v354_v1 = vmul.f32 %v387_v54, %v344_v62 }
 0x377   :  { %v363_v2 = vmax.f32 %v361_v0, 0.0  ;;  %v362_v3 = vadd.f32 %v388_v59, %v354_v1 }
 0x379   :  { %365 = vst [vmem:[%s634_s12] sm:$0xff] %v363_v2  ;;  %v364_v4 = vmax.f32 %v362_v3, 0.0 }
 0x37b   :  { %366 = vst [vmem:[%s634_s12 + $0x8] sm:$0xff] %v364_v4 }

// kernel: fwd.6
= control target key start
LH: loop header
LB: loop body
LE: loop exit
PB: predicated region body
PF: predicated region fallthrough
CT: control target
= control target key end

     0   :  { %v711_v0 = vmov 0.0   ;;  %vm712_vm0 = vmmov 0   ;;  %vm63_vm1 = vcmask 261120   ;;  %vm124_vm2 = vcmask 392192   ;;  %s954_s0 = inlined_call_operand.vmem [shape: f32[32,128], index: 0, kind: input, shape index: {}]   ;;  %s955_s1 = inlined_call_operand.vmem [shape: f32[48,128], index: 1, kind: input, shape index: {}]   ;;  %s956_s2 = inlined_call_operand.vmem [shape: bf16[16,32], index: 2, kind: input, shape index: {}]   ;;  %s957_s3 = inlined_call_operand.vmem [shape: bf16[16,48], index: 3, kind: input, shape index: {}]   ;;  %s958_s6 = inlined_call_operand.vmem [shape: bf16[128,128], index: 6, kind: input, shape index: {}]   ;;  %s959_s11 = inlined_call_operand.vmem [shape: f32[16,1], index: 11, kind: input, shape index: {}]   ;;  %s960_s4 = inlined_call_operand.vmem [shape: bf16[128,128], index: 4, kind: input, shape index: {}]   ;;  %s961_s9 = inlined_call_operand.vmem [shape: bf16[16,16], index: 9, kind: input, shape index: {}]   ;;  %s962_s7 = inlined_call_operand.vmem [shape: f32[1,128], index: 7, kind: input, shape index: {}]   ;;  %s963_s5 = inlined_call_operand.vmem [shape: f32[1,128], index: 5, kind: input, shape index: {}]   ;;  %s964_s15 = inlined_call_operand.vmem [shape: f32[16,128], index: 15, kind: output, shape index: {1}]   ;;  %s965_s10 = inlined_call_operand.vmem [shape: bf16[16,16], index: 10, kind: input, shape index: {}]   ;;  %s966_s8 = inlined_call_operand.vmem [shape: f32[1,128], index: 8, kind: input, shape index: {}]   ;;  %s967_s12 = inlined_call_operand.vmem [shape: f32[1,128], index: 12, kind: input, shape index: {}]   ;;  %s968_s13 = inlined_call_operand.vmem [shape: f32[1,128], index: 13, kind: input, shape index: {}]   ;;  %s969_s14 = inlined_call_operand.vmem [shape: f32[16,128], index: 14, kind: output, shape index: {0}]  }
   0x1   :  { %617 = vmatprep.subr.bf16.mxu0 %v711_v0  ;;  %v52_v1 = vld [vmem:[%s954_s0] sm:$0xff]  ;;  %v53_v2 = vld [vmem:[%s954_s0 + $0x8] sm:$0xff]  ;;  %v54_v3 = vld [vmem:[%s954_s0 + $0x10] sm:$0xff]  ;;  %621 = vmatprep.mubr.msk.bf16.mxu0 %vm712_vm0, %v711_v0  ;;  %v713_v26 = vmov 0   ;;  %vm412_vm3 = vcmask 130048  }
   0x2   :  { %v56_v4 = vpack.c.bf16 %v53_v2, %v52_v1  ;;  %v55_v5 = vld [vmem:[%s954_s0 + $0x18] sm:$0xff]  ;;  %625 = vmatprep.subr.bf16.mxu1 %v711_v0  ;;  %631 = vmatprep.mubr.msk.bf16.mxu1 %vm712_vm0, %v711_v0  ;;  %v110_v6 = vld [vmem:[%s955_s1] sm:$0xff]  ;;  %v111_v7 = vld [vmem:[%s955_s1 + $0x8] sm:$0xff] }
   0x3   :  { %v57_v8 = vpack.c.bf16 %v55_v5, %v54_v3  ;;  %v116_v9 = vpack.c.bf16 %v111_v7, %v110_v6  ;;  %v112_v10 = vld [vmem:[%s955_s1 + $0x10] sm:$0xff]  ;;  %v113_v11 = vld [vmem:[%s955_s1 + $0x18] sm:$0xff]  ;;  %v691_v12 = vld [vmem:[%s956_s2] sm:$0xff]   ;;  %690 = vset.pattern.permute.xlu0 %v713_v26 }
   0x4   :  { %618 = vmatpush3.bf16.msra.mxu0 %v56_v4  ;;  %v117_v13 = vpack.c.bf16 %v113_v11, %v112_v10  ;;  %v114_v14 = vld [vmem:[%s955_s1 + $0x20] sm:$0xff]  ;;  %v115_v15 = vld [vmem:[%s955_s1 + $0x28] sm:$0xff]  ;;  %v695_v20 = vld [vmem:[%s958_s6 + $0x10] sm:$0xff]  }
   0x5   :  { %619 = vmatprep.subr.bf16.mxu0 %v711_v0  ;;  %626 = vmatpush3.bf16.msra.mxu1 %v116_v9  ;;  %v118_v16 = vpack.c.bf16 %v115_v15, %v114_v14  ;;  %v692_v17 = vld [vmem:[%s957_s3] sm:$0xff]   ;;  %v694_v19 = vld [vmem:[%s958_s6 + $0x8] sm:$0xff]   ;;  %v696_v21 = vld [vmem:[%s958_s6 + $0x18] sm:$0xff]  }
   0x6   :  { %627 = vmatprep.subr.bf16.mxu1 %v711_v0  ;;  %v693_v18 = vld [vmem:[%s958_s6] sm:$0xff]   ;;  %v698_v23 = vld [vmem:[%s958_s6 + $0x28] sm:$0xff]   ;;  %v699_v24 = vld [vmem:[%s958_s6 + $0x30] sm:$0xff]  }
   0x7   :  { %v697_v22 = vld [vmem:[%s958_s6 + $0x20] sm:$0xff]   ;;  %v700_v25 = vld [vmem:[%s958_s6 + $0x38] sm:$0xff]   ;;  %v307_v29 = vld [vmem:[%s959_s11 + $0x8] sm:$0xff] }
   0x8   :  { %620 = vmatpush3.bf16.msra.mxu0 %v57_v8  ;;  %v306_v27 = vld [vmem:[%s959_s11] sm:$0xff]  ;;  %v702_v30 = vld [vmem:[%s960_s4 + $0x8] sm:$0xff]   ;;  %v703_v31 = vld [vmem:[%s960_s4 + $0x10] sm:$0xff]  }
   0x9   :  { %635 = vmatprep.subr.bf16.mxu0 %v711_v0  ;;  %628 = vmatpush3.bf16.msra.mxu1 %v117_v13  ;;  %v701_v28 = vld [vmem:[%s960_s4] sm:$0xff]   ;;  %v704_v32 = vld [vmem:[%s960_s4 + $0x18] sm:$0xff]   ;;  %v706_v34 = vld [vmem:[%s960_s4 + $0x28] sm:$0xff]  }
   0xa   :  { %629 = vmatprep.subr.bf16.mxu1 %v711_v0  ;;  %472 = vperm.xlu0 %690, %v306_v27   ;;  %v705_v33 = vld [vmem:[%s960_s4 + $0x20] sm:$0xff]   ;;  %v707_v35 = vld [vmem:[%s960_s4 + $0x30] sm:$0xff]   ;;  %v708_v36 = vld [vmem:[%s960_s4 + $0x38] sm:$0xff]  }
   0xb   :  { %622 = vmatmul.mubr.msk.bf16.vlgmr.msra.gmra.mrb[0].mxu0 %vm63_vm1, %v691_v12  ;;  %v572_v47 = vld [vmem:[%s962_s7] ss:$0 sm:$0xff] }
   0xc   :  { %651 = vmatprep.mubr.msk.bf16.mxu0 %vm712_vm0, %v711_v0  ;;  %636 = vmatpush3.bf16.msra.mxu0 %v701_v28  ;;  %v563_v54 = vld [vmem:[%s963_s5] ss:$0 sm:$0xff] }
   0xd   :  { %630 = vmatpush3.bf16.msra.mxu1 %v118_v16  ;;  %637 = vmatprep.subr.bf16.mxu0 %v711_v0  ;;  %v709_v56 = vld [vmem:[%s961_s9] sm:$0xff]  }
   0xe   :  { %655 = vmatprep.subr.bf16.mxu1 %v711_v0  ;;  %477 = vperm.xlu0 %690, %v307_v29   ;;  %v710_v8 = vld [vmem:[%s965_s10] sm:$0xff]  }
   0xf   :  { %v583_v9 = vld [vmem:[%s966_s8] ss:$0 sm:$0xff] }
  0x10   :  { %632 = vmatmul.mubr.msk.bf16.vlgmr.msra.gmra.mrb[0].mxu1 %vm124_vm2, %v692_v17  ;;  %638 = vmatpush3.bf16.msra.mxu0 %v702_v30  ;;  %v586_v17 = vld [vmem:[%s967_s12] ss:$0 sm:$0xff] }
  0x11   :  { %656 = vmatpush3.bf16.msra.mxu1 %v693_v18  ;;  %671 = vmatprep.mubr.msk.bf16.mxu1 %vm712_vm0, %v711_v0 }
  0x12   :  { %657 = vmatprep.subr.bf16.mxu1 %v711_v0  ;;  %639 = vmatprep.subr.bf16.mxu0 %v711_v0 }
  0x14   :  { %640 = vmatpush3.bf16.msra.mxu0 %v703_v31 }
  0x15   :  { %658 = vmatpush3.bf16.msra.mxu1 %v694_v19  ;;  %641 = vmatprep.subr.bf16.mxu0 %v711_v0 }
  0x16   :  { %659 = vmatprep.subr.bf16.mxu1 %v711_v0 }
  0x18   :  { %642 = vmatpush3.bf16.msra.mxu0 %v704_v32 }
  0x19   :  { %660 = vmatpush3.bf16.msra.mxu1 %v695_v20  ;;  %643 = vmatprep.subr.bf16.mxu0 %v711_v0 }
  0x1a   :  { %661 = vmatprep.subr.bf16.mxu1 %v711_v0 }
  0x1c   :  { %644 = vmatpush3.bf16.msra.mxu0 %v705_v33 }
  0x1d   :  { %662 = vmatpush3.bf16.msra.mxu1 %v696_v21  ;;  %645 = vmatprep.subr.bf16.mxu0 %v711_v0 }
  0x1e   :  { %663 = vmatprep.subr.bf16.mxu1 %v711_v0 }
  0x20   :  { %646 = vmatpush3.bf16.msra.mxu0 %v706_v34 }
  0x21   :  { %664 = vmatpush3.bf16.msra.mxu1 %v697_v22  ;;  %647 = vmatprep.subr.bf16.mxu0 %v711_v0  ;;  %v587_v22 = vld [vmem:[%s968_s13] ss:$0 sm:$0xff] }
  0x22   :  { %665 = vmatprep.subr.bf16.mxu1 %v711_v0 }
  0x24   :  { %648 = vmatpush3.bf16.msra.mxu0 %v707_v35 }
  0x25   :  { %666 = vmatpush3.bf16.msra.mxu1 %v698_v23  ;;  %649 = vmatprep.subr.bf16.mxu0 %v711_v0 }
  0x26   :  { %667 = vmatprep.subr.bf16.mxu1 %v711_v0 }
  0x28   :  { %650 = vmatpush3.bf16.msra.mxu0 %v708_v36 }
  0x29   :  { %668 = vmatpush3.bf16.msra.mxu1 %v699_v24  ;;  %675 = vmatprep.subr.bf16.mxu0 %v711_v0 }
  0x2a   :  { %669 = vmatprep.subr.bf16.mxu1 %v711_v0 }
  0x2d   :  { %670 = vmatpush3.bf16.msra.mxu1 %v700_v25 }
  0x2e   :  { %681 = vmatprep.subr.bf16.mxu1 %v711_v0 }
  0x89   :  { %v473_v11 = vpop.permute.xlu0 %472 }
  0x8d   :  { %v478_v15 = vpop.permute.xlu0 %477 }
  0xde   :  { %v101_v37 = vpop.f32.mrb[0].mxu0 }
  0xdf   :  { %v623_v38 = vpop.f32.mrb[1].mxu0 }
  0xe0   :  { %v104_v39 = vpop.f32.mrb[2].mxu0 }
  0xe1   :  { %v310_v40 = vpack.c.bf16 %v104_v39, %v101_v37  ;;  %v624_v41 = vpop.f32.mrb[3].mxu0 }
  0xe3   :  { %672 = vmatmul.mubr.bf16.vlgmr.msra.gmra.mrb[4].mxu1 %v310_v40  ;;  %v162_v42 = vpop.f32.mrb[0].mxu1 }
  0xe4   :  { %683 = vmatprep.mubr.msk.bf16.mxu1 %vm712_vm0, %v711_v0  ;;  %v633_v43 = vpop.f32.mrb[1].mxu1 }
  0xe5   :  { %v165_v44 = vpop.f32.mrb[2].mxu1 }
  0xe6   :  { %v169_v45 = vpack.c.bf16 %v165_v44, %v162_v42  ;;  %v634_v46 = vpop.f32.mrb[3].mxu1 }
  0xe8   :  { %652 = vmatmul.mubr.bf16.vlgmr.msra.gmra.mrb[4].mxu0 %v169_v45 }
  0xe9   :  { %677 = vmatprep.mubr.msk.bf16.mxu0 %vm712_vm0, %v711_v0 }
 0x1b6   :  { %v399_v48 = vpop.f32.mrb[4].mxu1 }
 0x1b7   :  { %v673_v49 = vpop.f32.mrb[5].mxu1  ;;  %v400_v51 = vadd.f32 %v572_v47, %v399_v48 }
 0x1b8   :  { %v402_v50 = vpop.f32.mrb[6].mxu1 }
 0x1b9   :  { %v403_v52 = vadd.f32 %v572_v47, %v402_v50  ;;  %v674_v53 = vpop.f32.mrb[7].mxu1  ;;  %v466_v10 = vadd.f32 %v583_v9, %v400_v51 }
 0x1bb   :  { %v406_v55 = vpack.c.bf16 %v403_v52, %v400_v51  ;;  %v275_v57 = vpop.f32.mrb[4].mxu0  ;;  %v467_v12 = vadd.f32 %v583_v9, %v403_v52  ;;  %v468_v13 = vmax.f32 %v466_v10, 0.0 }
 0x1bc   :  { %v276_v58 = vadd.f32 %v563_v54, %v275_v57  ;;  %v653_v59 = vpop.f32.mrb[5].mxu0 }
 0x1bd   :  { %676 = vmatpush3.bf16.msra.mxu0 %v406_v55  ;;  %v278_v60 = vpop.f32.mrb[6].mxu0  ;;  %v469_v14 = vmax.f32 %v467_v12, 0.0  ;;  %v480_v16 = vmul.f32 %v473_v11, %v468_v13 }
 0x1be   :  { %282 = vst [vmem:[%s964_s15] sm:$0xff] %v276_v58  ;;  %v279_v61 = vadd.f32 %v563_v54, %v278_v60  ;;  %v654_v62 = vpop.f32.mrb[7].mxu0 }
 0x1bf   :  { %v481_v19 = vmul.f32 %v478_v15, %v469_v14 }
 0x1c0   :  { %678 = vmatmul.mubr.msk.bf16.vlgmr.msra.gmra.mrb[8].mxu0 %vm412_vm3, %v709_v56  ;;  %283 = vst [vmem:[%s964_s15 + $0x8] sm:$0xff] %v279_v61 }
 0x293   :  { %v450_v63 = vpop.f32.mrb[8].mxu0 }
 0x294   :  { %v451_v0 = vadd.f32 %v450_v63, %v276_v58  ;;  %v679_v1 = vpop.f32.mrb[9].mxu0 }
 0x295   :  { %v453_v2 = vpop.f32.mrb[10].mxu0 }
 0x296   :  { %v454_v3 = vadd.f32 %v453_v2, %v279_v61  ;;  %v680_v4 = vpop.f32.mrb[11].mxu0  ;;  %v457_v5 = vmax.f32 %v451_v0, 0.0 }
 0x298   :  { %v458_v6 = vmax.f32 %v454_v3, 0.0 }
 0x29a   :  { %v459_v7 = vpack.c.bf16 %v458_v6, %v457_v5 }
 0x29c   :  { %682 = vmatpush3.bf16.msra.mxu1 %v459_v7 }
 0x29f   :  { %684 = vmatmul.mubr.msk.bf16.vlgmr.msra.gmra.mrb[8].mxu1 %vm412_vm3, %v710_v8 }
 0x372   :  { %v524_v18 = vpop.f32.mrb[8].mxu1 }
 0x373   :  { %v525_v20 = vadd.f32 %v524_v18, %v480_v16  ;;  %v685_v21 = vpop.f32.mrb[9].mxu1 }
 0x374   :  { %v527_v23 = vpop.f32.mrb[10].mxu1 }
 0x375   :  { %v537_v24 = vmul.f32 %v586_v17, %v525_v20  ;;  %v528_v25 = vadd.f32 %v527_v23, %v481_v19  ;;  %v686_v26 = vpop.f32.mrb[11].mxu1 }
 0x377   :  { %v545_v27 = vadd.f32 %v587_v22, %v537_v24  ;;  %v538_v28 = vmul.f32 %v586_v17, %v528_v25 }
 0x379   :  { %v547_v29 = vmax.f32 %v545_v27, 0.0  ;;  %v546_v30 = vadd.f32 %v587_v22, %v538_v28 }
 0x37b   :  { %549 = vst [vmem:[%s969_s14] sm:$0xff] %v547_v29  ;;  %v548_v31 = vmax.f32 %v546_v30, 0.0 }
 0x37d   :  { %550 = vst [vmem:[%s969_s14 + $0x8] sm:$0xff] %v548_v31 }

// kernel: fwd.9
= control target key start
LH: loop header
LB: loop body
LE: loop exit
PB: predicated region body
PF: predicated region fallthrough
CT: control target
= control target key end

     0   :  { %vm63_vm0 = vcmask 130048   ;;  %v614_v13 = vmov 0   ;;  %v615_v32 = vmov 0.0   ;;  %vm616_vm1 = vmmov 0   ;;  %s820_s0 = inlined_call_operand.vmem [shape: f32[16,128], index: 0, kind: input, shape index: {}]   ;;  %s821_s1 = inlined_call_operand.vmem [shape: bf16[32,16], index: 1, kind: input, shape index: {}]   ;;  %s822_s4 = inlined_call_operand.vmem [shape: bf16[128,128], index: 4, kind: input, shape index: {}]   ;;  %s823_s9 = inlined_call_operand.vmem [shape: f32[32,1], index: 9, kind: input, shape index: {}]   ;;  %s824_s2 = inlined_call_operand.vmem [shape: f32[32,128], index: 2, kind: input, shape index: {}]   ;;  %s825_s7 = inlined_call_operand.vmem [shape: bf16[48,32], index: 7, kind: input, shape index: {}]   ;;  %s826_s5 = inlined_call_operand.vmem [shape: f32[1,128], index: 5, kind: input, shape index: {}]   ;;  %s827_s8 = inlined_call_operand.vmem [shape: bf16[32,48], index: 8, kind: input, shape index: {}]   ;;  %s828_s3 = inlined_call_operand.vmem [shape: f32[48,128], index: 3, kind: input, shape index: {}]   ;;  %s829_s6 = inlined_call_operand.vmem [shape: f32[1,128], index: 6, kind: input, shape index: {}]   ;;  %s830_s10 = inlined_call_operand.vmem [shape: f32[1,128], index: 10, kind: input, shape index: {}]   ;;  %s831_s11 = inlined_call_operand.vmem [shape: f32[1,128], index: 11, kind: input, shape index: {}]   ;;  %s832_s12 = inlined_call_operand.vmem [shape: f32[32,128], index: 12, kind: output, shape index: {}]  }
   0x1   :  { %v46_v0 = vld [vmem:[%s820_s0] sm:$0xff]  ;;  %v47_v1 = vld [vmem:[%s820_s0 + $0x8] sm:$0xff]  ;;  %v603_v7 = vld [vmem:[%s822_s4 + $0x10] sm:$0xff]   ;;  %598 = vset.pattern.permute.xlu1 %v614_v13  ;;  %597 = vset.pattern.permute.xlu0 %v614_v13  ;;  %vm281_vm2 = vcmask 261120   ;;  %vm405_vm3 = vcmask 392192  }
   0x2   :  { %v48_v2 = vpack.c.bf16 %v47_v1, %v46_v0  ;;  %v599_v3 = vld [vmem:[%s821_s1] sm:$0xff]   ;;  %v600_v4 = vld [vmem:[%s821_s1 + $0x8] sm:$0xff]   ;;  %v604_v8 = vld [vmem:[%s822_s4 + $0x18] sm:$0xff]  }
   0x3   :  { %544 = vmatprep.mubr.msk.bf16.mxu0 %vm63_vm0, %v599_v3  ;;  %v601_v5 = vld [vmem:[%s822_s4] sm:$0xff]   ;;  %v602_v6 = vld [vmem:[%s822_s4 + $0x8] sm:$0xff]   ;;  %v607_v11 = vld [vmem:[%s822_s4 + $0x30] sm:$0xff]  }
   0x4   :  { %542 = vmatprep.subr.bf16.mxu0 %v48_v2  ;;  %548 = vmatprep.subr.bf16.mxu1 %v601_v5  ;;  %v605_v9 = vld [vmem:[%s822_s4 + $0x20] sm:$0xff]   ;;  %v606_v10 = vld [vmem:[%s822_s4 + $0x28] sm:$0xff]   ;;  %v608_v12 = vld [vmem:[%s822_s4 + $0x38] sm:$0xff]  }
   0x5   :  { %543 = vmatpush3.bf16.msra.mxu0 %v48_v2  ;;  %549 = vmatpush3.bf16.msra.mxu1 %v601_v5  ;;  %v155_v14 = vld [vmem:[%s823_s9 + $0x10] sm:$0xff]  ;;  %v153_v15 = vld [vmem:[%s823_s9] sm:$0xff]  ;;  %v156_v16 = vld [vmem:[%s823_s9 + $0x18] sm:$0xff] }
   0x6   :  { %550 = vmatprep.subr.bf16.mxu1 %v602_v6  ;;  %383 = vperm.xlu1 %598, %v155_v14   ;;  %v154_v17 = vld [vmem:[%s823_s9 + $0x8] sm:$0xff]  ;;  %v51_v18 = vld [vmem:[%s824_s2 + $0x10] sm:$0xff]  ;;  %v52_v20 = vld [vmem:[%s824_s2 + $0x18] sm:$0xff] }
   0x7   :  { %373 = vperm.xlu0 %597, %v153_v15   ;;  %v49_v22 = vld [vmem:[%s824_s2] sm:$0xff]  ;;  %v50_v23 = vld [vmem:[%s824_s2 + $0x8] sm:$0xff]  ;;  %568 = vmatprep.subr.bf16.mxu0 %v615_v32  ;;  %v611_v46 = vld [vmem:[%s825_s7 + $0x10] sm:$0xff]  }
   0x8   :  { %545 = vmatmul.mubr.msk.bf16.vlgmr.msra.gmra.mrb[0].mxu0 %vm63_vm0, %v600_v4  ;;  %v497_v34 = vld [vmem:[%s826_s5] ss:$0 sm:$0xff]  ;;  %v610_v45 = vld [vmem:[%s825_s7 + $0x8] sm:$0xff]   ;;  %v121_v58 = vld [vmem:[%s828_s3 + $0x10] sm:$0xff] }
   0x9   :  { %551 = vmatpush3.bf16.msra.mxu1 %v602_v6  ;;  %572 = vmatprep.mubr.msk.bf16.mxu0 %vm616_vm1, %v615_v32  ;;  %v609_v44 = vld [vmem:[%s825_s7] sm:$0xff]   ;;  %v120_v50 = vld [vmem:[%s828_s3 + $0x8] sm:$0xff]  ;;  %v122_v61 = vld [vmem:[%s828_s3 + $0x18] sm:$0xff] }
   0xa   :  { %552 = vmatprep.subr.bf16.mxu1 %v603_v7  ;;  %388 = vperm.xlu1 %598, %v156_v16   ;;  %v612_v47 = vld [vmem:[%s827_s8] sm:$0xff]  }
   0xb   :  { %378 = vperm.xlu0 %597, %v154_v17   ;;  %v119_v48 = vld [vmem:[%s828_s3] sm:$0xff]  ;;  %v613_v17 = vld [vmem:[%s827_s8 + $0x8] sm:$0xff]  }
   0xc   :  { %v123_v5 = vld [vmem:[%s828_s3 + $0x20] sm:$0xff] }
   0xd   :  { %553 = vmatpush3.bf16.msra.mxu1 %v603_v7 }
   0xe   :  { %554 = vmatprep.subr.bf16.mxu1 %v604_v8 }
  0x11   :  { %555 = vmatpush3.bf16.msra.mxu1 %v604_v8  ;;  %v124_v8 = vld [vmem:[%s828_s3 + $0x28] sm:$0xff] }
  0x12   :  { %556 = vmatprep.subr.bf16.mxu1 %v605_v9 }
  0x15   :  { %557 = vmatpush3.bf16.msra.mxu1 %v605_v9 }
  0x16   :  { %558 = vmatprep.subr.bf16.mxu1 %v606_v10 }
  0x19   :  { %559 = vmatpush3.bf16.msra.mxu1 %v606_v10 }
  0x1a   :  { %560 = vmatprep.subr.bf16.mxu1 %v607_v11 }
  0x1d   :  { %561 = vmatpush3.bf16.msra.mxu1 %v607_v11 }
  0x1e   :  { %562 = vmatprep.subr.bf16.mxu1 %v608_v12 }
  0x21   :  { %563 = vmatpush3.bf16.msra.mxu1 %v608_v12 }
  0xdb   :  { %v546_v19 = vpop.f32.mrb[0].mxu0 }
  0xdc   :  { %v104_v21 = vpop.f32.mrb[1].mxu0  ;;  %v113_v25 = vadd.f32 %v546_v19, %v51_v18  ;;  %v512_v18 = vld [vmem:[%s829_s6] ss:$0 sm:$0xff] }
  0xdd   :  { %v547_v24 = vpop.f32.mrb[2].mxu0  ;;  %v105_v28 = vadd.f32 %v104_v21, %v49_v22  ;;  %v384_v21 = vpop.permute.xlu1 %383 }
  0xde   :  { %v116_v26 = vadd.f32 %v547_v24, %v52_v20  ;;  %v107_v27 = vpop.f32.mrb[3].mxu0 }
  0xdf   :  { %v108_v29 = vadd.f32 %v107_v27, %v50_v23  ;;  %v374_v23 = vpop.permute.xlu0 %373 }
  0xe0   :  { %v160_v30 = vpack.c.bf16 %v116_v26, %v113_v25 }
  0xe1   :  { %v159_v31 = vpack.c.bf16 %v108_v29, %v105_v28  ;;  %v389_v28 = vpop.permute.xlu1 %388 }
  0xe3   :  { %564 = vmatprep.mubr.bf16.mxu1 %v159_v31  ;;  %v379_v31 = vpop.permute.xlu0 %378 }
  0xe4   :  { %565 = vmatmul.mubr.bf16.vlgmr.msra.gmra.mrb[0].mxu1 %v160_v30 }
 0x1b7   :  { %v566_v33 = vpop.f32.mrb[0].mxu1 }
 0x1b8   :  { %v249_v35 = vpop.f32.mrb[1].mxu1  ;;  %v746_v37 = vadd.f32 %v566_v33, %v497_v34  ;;  %v517_v33 = vld [vmem:[%s830_s10] ss:$0 sm:$0xff] }
 0x1b9   :  { %v567_v36 = vpop.f32.mrb[2].mxu1  ;;  %v750_v40 = vadd.f32 %v497_v34, %v249_v35 }
 0x1ba   :  { %v748_v38 = vadd.f32 %v567_v36, %v497_v34  ;;  %v252_v39 = vpop.f32.mrb[3].mxu1  ;;  %v365_v19 = vadd.f32 %v512_v18, %v746_v37 }
 0x1bb   :  { %v752_v41 = vadd.f32 %v497_v34, %v252_v39  ;;  %v363_v20 = vadd.f32 %v512_v18, %v750_v40  ;;  %v518_v39 = vld [vmem:[%s831_s11] ss:$0 sm:$0xff] }
 0x1bc   :  { %v265_v42 = vpack.c.bf16 %v748_v38, %v746_v37  ;;  %v366_v22 = vadd.f32 %v512_v18, %v748_v38  ;;  %v369_v25 = vmax.f32 %v365_v19, 0.0 }
 0x1bd   :  { %v264_v43 = vpack.c.bf16 %v752_v41, %v750_v40  ;;  %v364_v24 = vadd.f32 %v512_v18, %v752_v41  ;;  %v367_v26 = vmax.f32 %v363_v20, 0.0 }
 0x1be   :  { %v370_v27 = vmax.f32 %v366_v22, 0.0  ;;  %v393_v30 = vmul.f32 %v384_v21, %v369_v25 }
 0x1bf   :  { %569 = vmatpush3.bf16.msra.mxu0 %v264_v43  ;;  %v368_v29 = vmax.f32 %v364_v24, 0.0 }
 0x1c0   :  { %570 = vmatprep.subr.bf16.mxu0 %v615_v32  ;;  %v394_v35 = vmul.f32 %v389_v28, %v370_v27 }
 0x1c1   :  { %v392_v38 = vmul.f32 %v379_v31, %v368_v29 }
 0x1c3   :  { %571 = vmatpush3.bf16.msra.mxu0 %v265_v42 }
 0x1c6   :  { %573 = vmatmul.mubr.msk.bf16.vlgmr.msra.gmra.mrb[4].mxu0 %vm281_vm2, %v609_v44 }
 0x1c7   :  { %576 = vmatprep.mubr.msk.bf16.mxu0 %vm616_vm1, %v615_v32 }
 0x1ce   :  { %577 = vmatmul.mubr.msk.bf16.gmra.mrb[8].mxu0 %vm281_vm2, %v610_v45 }
 0x1cf   :  { %580 = vmatprep.mubr.msk.bf16.mxu0 %vm616_vm1, %v615_v32  ;;  %v391_v32 = vmul.f32 %v374_v23, %v367_v26 }
 0x1d6   :  { %581 = vmatmul.mubr.msk.bf16.gmra.mrb[12].mxu0 %vm281_vm2, %v611_v46 }
 0x1d7   :  { %590 = vmatprep.mubr.msk.bf16.mxu0 %vm405_vm3, %v612_v47 }
 0x299   :  { %v325_v49 = vpop.f32.mrb[4].mxu0 }
 0x29a   :  { %v326_v51 = vadd.f32 %v325_v49, %v119_v48  ;;  %v574_v52 = vpop.f32.mrb[5].mxu0 }
 0x29b   :  { %v328_v53 = vpop.f32.mrb[6].mxu0 }
 0x29c   :  { %v329_v54 = vadd.f32 %v328_v53, %v120_v50  ;;  %v575_v55 = vpop.f32.mrb[7].mxu0  ;;  %v348_v56 = vmax.f32 %v326_v51, 0.0 }
 0x29e   :  { %v349_v57 = vmax.f32 %v329_v54, 0.0 }
 0x2a0   :  { %v354_v59 = vpack.c.bf16 %v349_v57, %v348_v56 }
 0x2a1   :  { %v333_v60 = vpop.f32.mrb[8].mxu0 }
 0x2a2   :  { %v334_v62 = vadd.f32 %v333_v60, %v121_v58  ;;  %v578_v63 = vpop.f32.mrb[9].mxu0  ;;  %584 = vmatprep.subr.bf16.mxu0 %v354_v59 }
 0x2a3   :  { %v336_v0 = vpop.f32.mrb[10].mxu0  ;;  %585 = vmatpush3.bf16.msra.mxu0 %v354_v59 }
 0x2a4   :  { %v337_v1 = vadd.f32 %v336_v0, %v122_v61  ;;  %v579_v2 = vpop.f32.mrb[11].mxu0  ;;  %v350_v3 = vmax.f32 %v334_v62, 0.0 }
 0x2a6   :  { %v351_v4 = vmax.f32 %v337_v1, 0.0 }
 0x2a8   :  { %v355_v6 = vpack.c.bf16 %v351_v4, %v350_v3 }
 0x2a9   :  { %v341_v7 = vpop.f32.mrb[12].mxu0 }
 0x2aa   :  { %v342_v9 = vadd.f32 %v341_v7, %v123_v5  ;;  %v582_v10 = vpop.f32.mrb[13].mxu0  ;;  %586 = vmatprep.subr.bf16.mxu0 %v355_v6 }
 0x2ab   :  { %v344_v11 = vpop.f32.mrb[14].mxu0  ;;  %587 = vmatpush3.bf16.msra.mxu0 %v355_v6 }
 0x2ac   :  { %v345_v12 = vadd.f32 %v344_v11, %v124_v8  ;;  %v583_v13 = vpop.f32.mrb[15].mxu0  ;;  %v352_v14 = vmax.f32 %v342_v9, 0.0 }
 0x2ae   :  { %v353_v15 = vmax.f32 %v345_v12, 0.0 }
 0x2b0   :  { %v356_v16 = vpack.c.bf16 %v353_v15, %v352_v14 }
 0x2b2   :  { %588 = vmatprep.subr.bf16.mxu0 %v356_v16 }
 0x2b3   :  { %589 = vmatpush3.bf16.msra.mxu0 %v356_v16 }
 0x2b6   :  { %591 = vmatmul.mubr.msk.bf16.vlgmr.msra.gmra.mrb[16].mxu0 %vm405_vm3, %v613_v17 }
 0x389   :  { %v592_v34 = vpop.f32.mrb[16].mxu0 }
 0x38a   :  { %v455_v36 = vadd.f32 %v592_v34, %v393_v30  ;;  %v446_v37 = vpop.f32.mrb[17].mxu0 }
 0x38b   :  { %v447_v40 = vadd.f32 %v446_v37, %v391_v32  ;;  %v593_v41 = vpop.f32.mrb[18].mxu0 }
 0x38c   :  { %v469_v42 = vmul.f32 %v517_v33, %v455_v36  ;;  %v458_v43 = vadd.f32 %v593_v41, %v394_v35  ;;  %v449_v44 = vpop.f32.mrb[19].mxu0 }
 0x38d   :  { %v467_v45 = vmul.f32 %v517_v33, %v447_v40  ;;  %v450_v46 = vadd.f32 %v449_v44, %v392_v38 }
 0x38e   :  { %v479_v47 = vadd.f32 %v518_v39, %v469_v42  ;;  %v470_v48 = vmul.f32 %v517_v33, %v458_v43 }
 0x38f   :  { %v477_v49 = vadd.f32 %v518_v39, %v467_v45  ;;  %v468_v50 = vmul.f32 %v517_v33, %v450_v46 }
 0x390   :  { %v483_v51 = vmax.f32 %v479_v47, 0.0  ;;  %v480_v52 = vadd.f32 %v518_v39, %v470_v48 }
 0x391   :  { %v481_v53 = vmax.f32 %v477_v49, 0.0  ;;  %v478_v54 = vadd.f32 %v518_v39, %v468_v50 }
 0x392   :  { %487 = vst [vmem:[%s832_s12 + $0x10] sm:$0xff] %v483_v51  ;;  %v484_v55 = vmax.f32 %v480_v52, 0.0 }
 0x393   :  { %485 = vst [vmem:[%s832_s12] sm:$0xff] %v481_v53  ;;  %v482_v56 = vmax.f32 %v478_v54, 0.0 }
 0x394   :  { %488 = vst [vmem:[%s832_s12 + $0x18] sm:$0xff] %v484_v55 }
 0x395   :  { %486 = vst [vmem:[%s832_s12 + $0x8] sm:$0xff] %v482_v56 }

</bundles_post_ra>
